<compile_context>
chip_gen: v7x
topology: tpu7x:2x2x1
jax: 0.10.0
libtpu: 0.0.40
codegen_flags: <defaults>
</compile_context>

<pallas_src>
import jax
import jax.numpy as jnp
from jax import lax
from jax.experimental import pallas as pl
from jax.experimental.pallas import tpu as pltpu

_EPS = 1e-5
_LANE = 128


def _ceil_to(x, m):
    return ((x + m - 1) // m) * m


# --------------------------- fused Pallas kernel ------------------------------

def _make_fused_upstage_kernel(num_blk, H, W, out_c, mid, P, dilation):
    """Whole ResBlock chain + fused upsample/transpose epilogue for one image."""
    HW = H * W
    d = dilation
    PADR = d * W + d                       # flattened-row halo for the dilated conv
    HWpad = _ceil_to(HW, _LANE)
    offsets = [((kh - 1) * d, (kw - 1) * d) for kh in range(3) for kw in range(3)]
    w_pow2 = (W & (W - 1)) == 0
    n_rest = 3 if num_blk > 1 else 0

    def kernel(*refs):
        x_ref = refs[0]
        s1_0, b1_0, w1_0, wsc0 = refs[1:5]
        if num_blk > 1:
            s1r, b1r, w1r = refs[5:8]
        s2, b2, w2p, s3, b3, w3 = refs[5 + n_rest:11 + n_rest]
        up_ref = refs[11 + n_rest]
        o_ref = refs[12 + n_rest]
        apad = refs[13 + n_rest]           # persistent VMEM scratch (HW+2*PADR, P)

        # ---- constants hoisted out of all loops (once per image, VPU-cheap) --
        lane = lax.broadcasted_iota(jnp.int32, (HW, P), 1)
        row = lax.broadcasted_iota(jnp.int32, (HW, P), 0)
        col = (row & (W - 1)) if w_pow2 else (row % W)
        valid_neg = col >= d               # source column in-range for ox = -d
        valid_pos = col < (W - d)          # source column in-range for ox = +d

        # Zero the conv halo rows of the scratch; the middle rows are fully
        # overwritten every block, halo rows never are.  (Done every grid step
        # so it stays correct when the batch axis is split across cores.)
        zhalo = jnp.zeros((PADR, P), jnp.float32)
        apad[0:PADR, :] = zhalo
        apad[PADR + HW:PADR + HW + PADR, :] = zhalo

        x = None
        for blk in range(num_blk):
            if blk == 0:
                xin = x_ref[0].astype(jnp.float32)           # (HW, in_c)
                s1v, b1v, w1v = s1_0[...], b1_0[...], w1_0[...]
            else:
                xin = x                                       # (HW, P) f32
                s1v, b1v, w1v = s1r[blk - 1], b1r[blk - 1], w1r[blk - 1]

            # ---- BN1 + ReLU + 1x1 conv.  w1's mid columns are replicated at
            #      every tap block, so the im2col channel replication comes for
            #      free out of this single matmul. --------------------------
            h = jnp.maximum(xin * s1v + b1v, 0.0)
            h1 = jnp.dot(h.astype(jnp.bfloat16), w1v,
                         preferred_element_type=jnp.float32)  # (HW, P)

            # ---- BN2 + ReLU (scale/bias replicated over taps like w1) -------
            a = jnp.maximum(h1 * s2[blk] + b2[blk], 0.0)

            # ---- im2col slab: lane block t = activation shifted by tap t,
            #      zeroed when the source pixel is outside the image (y handled
            #      by the zero halo rows, x by the hoisted column masks). -----
            apad[PADR:PADR + HW, :] = a
            slab = None
            for t, (oy, ox) in enumerate(offsets):
                start = PADR + oy * W + ox
                win = apad[start:start + HW, :]
                m = jnp.logical_and(lane >= t * mid, lane < (t + 1) * mid)
                if ox < 0:
                    m = jnp.logical_and(m, valid_neg)
                elif ox > 0:
                    m = jnp.logical_and(m, valid_pos)
                piece = jnp.where(m, win, 0.0)
                slab = piece if slab is None else slab + piece

            # ---- the whole 3x3 dilated conv as ONE MXU matmul (K = 9*mid) ---
            conv = jnp.dot(slab.astype(jnp.bfloat16), w2p[blk],
                           preferred_element_type=jnp.float32)        # (HW, P)

            # ---- BN3 + ReLU + 1x1 conv + shortcut ---------------------------
            g = jnp.maximum(conv * s3[blk] + b3[blk], 0.0)
            out = jnp.dot(g.astype(jnp.bfloat16), w3[blk],
                          preferred_element_type=jnp.float32)         # (HW, P)
            if blk == 0:
                # channel-reduction shortcut as one small matmul (K = in_c)
                out = out + jnp.dot(xin.astype(jnp.bfloat16), wsc0[...],
                                    preferred_element_type=jnp.float32)
            else:
                out = out + x              # exact f32 identity shortcut
            x = out

        # ---- fused epilogue: slice to out_c, NHWC->NCHW transpose, nearest
        #      2x upsample via a 0/1 gather matmul, one lane-dense f32 store --
        if HWpad != HW:
            x = jnp.concatenate(
                [x, jnp.zeros((HWpad - HW, P), jnp.float32)], axis=0)
        xt = x.T                                                      # (P, HWpad)
        o_ref[0] = jnp.dot(xt[:out_c, :], up_ref[...],
                           preferred_element_type=jnp.float32)        # (out_c, 4HW)

    return kernel


# --------------------------- parameter packing --------------------------------

def _pack_params(blocks, in_c, out_c, mid, P, k, H, W):
    """Pack / replicate / zero-pad all per-block params for the fused kernel."""
    nb = len(blocks)
    HW = H * W
    HWpad = _ceil_to(HW, _LANE)
    bf = lambda a: a.astype(jnp.bfloat16)

    def rep_cols(w1):
        # (cin, mid) -> (cin, P): mid columns replicated at every tap block.
        cin = w1.shape[0]
        wr = jnp.zeros((cin, P), jnp.float32)
        for t in range(9):
            wr = wr.at[:, t * mid:(t + 1) * mid].set(w1)
        return wr

    def rep_bn(s, b):
        sr = jnp.zeros((1, P), jnp.float32)
        br = jnp.zeros((1, P), jnp.float32)
        for t in range(9):
            sr = sr.at[0, t * mid:(t + 1) * mid].set(s.reshape(-1))
            br = br.at[0, t * mid:(t + 1) * mid].set(b.reshape(-1))
        return sr, br

    def pad_bn(s, b, c):
        sp = jnp.zeros((1, P), jnp.float32).at[0, :c].set(s.reshape(-1))
        bp = jnp.zeros((1, P), jnp.float32).at[0, :c].set(b.reshape(-1))
        return sp, bp

    def pack_w2(w2):
        # (3,3,mid,mid) HWIO -> (P,P): row t*mid+j carries w2[tap t][j, :mid].
        wt = jnp.zeros((P, P), jnp.float32)
        w9 = w2.reshape(9, mid, mid)
        for t in range(9):
            wt = wt.at[t * mid:(t + 1) * mid, :mid].set(w9[t])
        return wt

    p0 = blocks[0]
    s1_0 = p0["s1"].reshape(1, in_c).astype(jnp.float32)
    b1_0 = p0["b1"].reshape(1, in_c).astype(jnp.float32)
    w1_0 = bf(rep_cols(p0["w1"]))
    wsc0 = bf(jnp.zeros((in_c, P), jnp.float32)
              .at[jnp.arange(in_c), jnp.arange(in_c) // k].set(1.0))

    s1r, b1r, w1r = [], [], []
    s2s, b2s, w2s, s3s, b3s, w3s = [], [], [], [], [], []
    for i, p in enumerate(blocks):
        if i > 0:
            sp, bp = pad_bn(p["s1"], p["b1"], out_c)
            s1r.append(sp); b1r.append(bp)
            wr = jnp.zeros((P, P), jnp.float32).at[:out_c, :].set(rep_cols(p["w1"]))
            w1r.append(wr)
        sp, bp = rep_bn(p["s2"], p["b2"]); s2s.append(sp); b2s.append(bp)
        sp, bp = pad_bn(p["s3"], p["b3"], mid); s3s.append(sp); b3s.append(bp)
        w2s.append(pack_w2(p["w2"]))
        w3s.append(jnp.zeros((P, P), jnp.float32).at[:mid, :out_c].set(p["w3"]))

    # 0/1 gather matrix: transposed activations (out_c, HWpad) @ U -> nearest-2x
    # upsampled NCHW rows (out_c, 2H*2W).  Rows >= HW are zero padding.
    m = jnp.arange(4 * HW)
    src = (m // (2 * W)) // 2 * W + (m % (2 * W)) // 2
    U = jnp.zeros((HWpad, 4 * HW), jnp.float32).at[src, m].set(1.0)

    params = [s1_0, b1_0, w1_0, wsc0]
    if nb > 1:
        params += [jnp.stack(s1r), jnp.stack(b1r), bf(jnp.stack(w1r))]
    params += [jnp.stack(s2s), jnp.stack(b2s), bf(jnp.stack(w2s)),
               jnp.stack(s3s), jnp.stack(b3s), bf(jnp.stack(w3s)), U]
    return params


# --------------------------- UpStage forward ----------------------------------

def upstage_forward(x_nchw, blocks, k, dilation=1):
    n, c, h, w = x_nchw.shape
    num_blk = len(blocks)
    mid = blocks[0]["w1"].shape[1]
    out_c = blocks[0]["w3"].shape[1]
    P = _ceil_to(max(c, out_c, 9 * mid), _LANE)
    assert 9 * mid <= P and out_c <= P and c <= P
    HW = h * w
    PADR = dilation * w + dilation

    # NCHW -> (N, HW, C): a single tiny XLA transpose of the UNPADDED input.
    # TODO(synk): ingest NCHW directly (channels-on-sublanes) to remove this too.
    x_flat = jnp.transpose(x_nchw, (0, 2, 3, 1)).reshape(n, HW, c)

    params = _pack_params(blocks, c, out_c, mid, P, k, h, w)
    kernel = _make_fused_upstage_kernel(num_blk, h, w, out_c, mid, P, dilation)

    def _const_spec(a):
        nd = a.ndim
        return pl.BlockSpec(a.shape, lambda i, _nd=nd: (0,) * _nd)

    y = pl.pallas_call(
        kernel,
        out_shape=jax.ShapeDtypeStruct((n, out_c, 4 * HW), jnp.float32),
        grid=(n,),
        in_specs=[pl.BlockSpec((1, HW, c), lambda i: (i, 0, 0))]
                 + [_const_spec(a) for a in params],
        out_specs=pl.BlockSpec((1, out_c, 4 * HW), lambda i: (i, 0, 0)),
        scratch_shapes=[pltpu.VMEM((HW + 2 * PADR, P), jnp.float32)],
        compiler_params=pltpu.CompilerParams(
            dimension_semantics=("parallel",),
            vmem_limit_bytes=32 * 1024 * 1024),
    )(x_flat, *params)

    # Kernel already produced upsampled NCHW rows; this reshape is free.
    return y.reshape(n, out_c, 2 * h, 2 * w)


# --------------------------- parameter init -----------------------------------

def _init_bn(key, c):
    k1, k2, k3, k4 = jax.random.split(key, 4)
    gamma = jax.random.uniform(k1, (c,), minval=0.5, maxval=1.5)
    beta = 0.1 * jax.random.normal(k2, (c,))
    mean = 0.1 * jax.random.normal(k3, (c,))
    var = jax.random.uniform(k4, (c,), minval=0.5, maxval=1.5)
    scale = gamma / jnp.sqrt(var + _EPS)
    bias = beta - mean * scale
    return (scale.reshape(1, c).astype(jnp.float32),
            bias.reshape(1, c).astype(jnp.float32))


def _init_resblock(key, in_c, out_c):
    mid = out_c // 4
    ks = jax.random.split(key, 6)
    s1, b1 = _init_bn(ks[0], in_c)
    s2, b2 = _init_bn(ks[2], mid)
    s3, b3 = _init_bn(ks[4], mid)
    return {
        "s1": s1, "b1": b1, "w1": (0.1 * jax.random.normal(ks[1], (in_c, mid))).astype(jnp.float32),
        "s2": s2, "b2": b2, "w2": (0.1 * jax.random.normal(ks[3], (3, 3, mid, mid))).astype(jnp.float32),
        "s3": s3, "b3": b3, "w3": (0.1 * jax.random.normal(ks[5], (mid, out_c))).astype(jnp.float32),
    }


def init_upstage_params(key, in_c, out_c, num_blk):
    keys = jax.random.split(key, num_blk)
    blocks = [_init_resblock(keys[0], in_c, out_c)]
    for i in range(1, num_blk):
        blocks.append(_init_resblock(keys[i], out_c, out_c))
    return blocks


# --------------------------- pure-JAX reference --------------------------------

def _ref_upstage(x_nchw, blocks, k, dilation):
    x = jnp.transpose(x_nchw, (0, 2, 3, 1)).astype(jnp.float32)

    def bnrelu(t, s, b):
        return jnp.maximum(t * s.reshape(1, 1, 1, -1) + b.reshape(1, 1, 1, -1), 0.0)

    def resblock(t, p, shortcut):
        h = jnp.einsum("nhwc,cd->nhwd", bnrelu(t, p["s1"], p["b1"]), p["w1"])
        h = bnrelu(h, p["s2"], p["b2"])
        h = jax.lax.conv_general_dilated(
            h, p["w2"], (1, 1), [(dilation, dilation)] * 2,
            rhs_dilation=(dilation, dilation),
            dimension_numbers=("NHWC", "HWIO", "NHWC"))
        h = jnp.einsum("nhwc,cd->nhwd", bnrelu(h, p["s3"], p["b3"]), p["w3"])
        return h + shortcut(t)

    def chan_red(t):
        n, hh, ww, c = t.shape
        return t.reshape(n, hh, ww, c // k, k).sum(-1)

    y = resblock(x, blocks[0], chan_red)
    for p in blocks[1:]:
        y = resblock(y, p, lambda t: t)
    y = jnp.repeat(jnp.repeat(y, 2, axis=1), 2, axis=2)
    return jnp.transpose(y, (0, 3, 1, 2))


# --------------------------- main ----------------------------------------------

if __name__ == "__main__":
    key = jax.random.PRNGKey(0)
    n, in_c, hh, ww = 2, 16, 8, 8
    out_c, num_blk, dilation = 8, 2, 1          # k = in_c // out_c = 2, mid_c = 2

    kx, kp = jax.random.split(key)
    x = jax.random.normal(kx, (n, in_c, hh, ww), jnp.float32)   # NCHW like PyTorch
    blocks = init_upstage_params(kp, in_c, out_c, num_blk)

    y = upstage_forward(x, blocks, in_c // out_c, dilation)
    y = jax.block_until_ready(y)

    assert y.shape == (n, out_c, 2 * hh, 2 * ww), y.shape
    y_ref = _ref_upstage(x, blocks, in_c // out_c, dilation)
    # bf16 MXU operands on the main path -> loose tolerance vs f32 reference
    err = float(jnp.max(jnp.abs(y - y_ref)))
    assert jnp.allclose(y, y_ref, rtol=5e-2, atol=5e-2), err

    print("KERNEL_OK")
</pallas_src>

<mosaic_0001>
module attributes {stable_mosaic.version = 11 : i64} {
  func.func @kernel(%arg0: i32, %arg1: memref<1x64x16xf32, #tpu.memory_space<vmem>>, %arg2: memref<1x16xf32, #tpu.memory_space<vmem>>, %arg3: memref<1x16xf32, #tpu.memory_space<vmem>>, %arg4: memref<16x128xbf16, #tpu.memory_space<vmem>>, %arg5: memref<16x128xbf16, #tpu.memory_space<vmem>>, %arg6: memref<1x1x128xf32, #tpu.memory_space<vmem>>, %arg7: memref<1x1x128xf32, #tpu.memory_space<vmem>>, %arg8: memref<1x128x128xbf16, #tpu.memory_space<vmem>>, %arg9: memref<2x1x128xf32, #tpu.memory_space<vmem>>, %arg10: memref<2x1x128xf32, #tpu.memory_space<vmem>>, %arg11: memref<2x128x128xbf16, #tpu.memory_space<vmem>>, %arg12: memref<2x1x128xf32, #tpu.memory_space<vmem>>, %arg13: memref<2x1x128xf32, #tpu.memory_space<vmem>>, %arg14: memref<2x128x128xbf16, #tpu.memory_space<vmem>>, %arg15: memref<128x256xf32, #tpu.memory_space<vmem>>, %arg16: memref<1x8x256xf32, #tpu.memory_space<vmem>>, %arg17: memref<82x128xf32, #tpu.memory_space<vmem>>) attributes {dimension_semantics = [#tpu.dimension_semantics<parallel>], iteration_bounds = array<i64: 2>, scalar_prefetch = 0 : i64, scratch_operands = 1 : i64, tpu.core_type = #tpu.core_type<tc>, window_params = [{transform_indices = @transform_0, window_bounds = array<i64: 1, 64, 16>}, {pipeline_mode = #tpu.pipeline_mode<synchronous>, transform_indices = @transform_1, window_bounds = array<i64: 1, 16>}, {pipeline_mode = #tpu.pipeline_mode<synchronous>, transform_indices = @transform_2, window_bounds = array<i64: 1, 16>}, {pipeline_mode = #tpu.pipeline_mode<synchronous>, transform_indices = @transform_3, window_bounds = array<i64: 16, 128>}, {pipeline_mode = #tpu.pipeline_mode<synchronous>, transform_indices = @transform_4, window_bounds = array<i64: 16, 128>}, {pipeline_mode = #tpu.pipeline_mode<synchronous>, transform_indices = @transform_5, window_bounds = array<i64: 1, 1, 128>}, {pipeline_mode = #tpu.pipeline_mode<synchronous>, transform_indices = @transform_6, window_bounds = array<i64: 1, 1, 128>}, {pipeline_mode = #tpu.pipeline_mode<synchronous>, transform_indices = @transform_7, window_bounds = array<i64: 1, 128, 128>}, {pipeline_mode = #tpu.pipeline_mode<synchronous>, transform_indices = @transform_8, window_bounds = array<i64: 2, 1, 128>}, {pipeline_mode = #tpu.pipeline_mode<synchronous>, transform_indices = @transform_9, window_bounds = array<i64: 2, 1, 128>}, {pipeline_mode = #tpu.pipeline_mode<synchronous>, transform_indices = @transform_10, window_bounds = array<i64: 2, 128, 128>}, {pipeline_mode = #tpu.pipeline_mode<synchronous>, transform_indices = @transform_11, window_bounds = array<i64: 2, 1, 128>}, {pipeline_mode = #tpu.pipeline_mode<synchronous>, transform_indices = @transform_12, window_bounds = array<i64: 2, 1, 128>}, {pipeline_mode = #tpu.pipeline_mode<synchronous>, transform_indices = @transform_13, window_bounds = array<i64: 2, 128, 128>}, {pipeline_mode = #tpu.pipeline_mode<synchronous>, transform_indices = @transform_14, window_bounds = array<i64: 128, 256>}, {transform_indices = @transform_15, window_bounds = array<i64: 1, 8, 256>}]} {
    %0 = tpu.iota {dimensions = array<i32: 1>} : vector<64x128xi32>
    %1 = tpu.iota {dimensions = array<i32: 0>} : vector<64x128xi32>
    %c7_i32 = arith.constant 7 : i32
    %2 = vector.broadcast %c7_i32 : i32 to vector<64x128xi32>
    %3 = arith.andi %1, %2 : vector<64x128xi32>
    %c1_i32 = arith.constant 1 : i32
    %4 = vector.broadcast %c1_i32 : i32 to vector<64x128xi32>
    %5 = arith.cmpi sge, %3, %4 : vector<64x128xi32>
    %c7_i32_0 = arith.constant 7 : i32
    %6 = vector.broadcast %c7_i32_0 : i32 to vector<64x128xi32>
    %7 = arith.cmpi slt, %3, %6 : vector<64x128xi32>
    %cst = arith.constant 0.000000e+00 : f32
    %8 = vector.broadcast %cst : f32 to vector<9x128xf32>
    %c0 = arith.constant 0 : index
    %c0_1 = arith.constant 0 : index
    %9 = vector.load %arg17[%c0, %c0_1] : memref<82x128xf32, #tpu.memory_space<vmem>>, vector<9x128xf32>
    tpu.vector_store %arg17[%c0, %c0_1], %8 {strides = array<i32>} : memref<82x128xf32, #tpu.memory_space<vmem>>, vector<9x128xf32>,
    %c73 = arith.constant 73 : index
    %c0_2 = arith.constant 0 : index
    %10 = vector.load %arg17[%c73, %c0_2] : memref<82x128xf32, #tpu.memory_space<vmem>>, vector<9x128xf32>
    tpu.vector_store %arg17[%c73, %c0_2], %8 {strides = array<i32>} : memref<82x128xf32, #tpu.memory_space<vmem>>, vector<9x128xf32>,
    %c0_3 = arith.constant 0 : index
    %c0_4 = arith.constant 0 : index
    %c0_5 = arith.constant 0 : index
    %11 = vector.load %arg1[%c0_3, %c0_4, %c0_5] : memref<1x64x16xf32, #tpu.memory_space<vmem>>, vector<1x64x16xf32>
    %12 = vector.shape_cast %11 : vector<1x64x16xf32> to vector<64x16xf32>
    %c0_6 = arith.constant 0 : index
    %c0_7 = arith.constant 0 : index
    %13 = vector.load %arg2[%c0_6, %c0_7] : memref<1x16xf32, #tpu.memory_space<vmem>>, vector<1x16xf32>
    %c0_8 = arith.constant 0 : index
    %c0_9 = arith.constant 0 : index
    %14 = vector.load %arg3[%c0_8, %c0_9] : memref<1x16xf32, #tpu.memory_space<vmem>>, vector<1x16xf32>
    %c0_10 = arith.constant 0 : index
    %c0_11 = arith.constant 0 : index
    %15 = vector.load %arg4[%c0_10, %c0_11] : memref<16x128xbf16, #tpu.memory_space<vmem>>, vector<16x128xbf16>
    %16 = vector.broadcast %13 : vector<1x16xf32> to vector<64x16xf32>
    %17 = arith.mulf %12, %16 : vector<64x16xf32>
    %18 = vector.broadcast %14 : vector<1x16xf32> to vector<64x16xf32>
    %19 = arith.addf %17, %18 : vector<64x16xf32>
    %cst_12 = arith.constant 0.000000e+00 : f32
    %20 = vector.broadcast %cst_12 : f32 to vector<64x16xf32>
    %21 = arith.maximumf %19, %20 : vector<64x16xf32>
    %22 = arith.truncf %21 : vector<64x16xf32> to vector<64x16xbf16>
    %cst_13 = arith.constant dense<0.000000e+00> : vector<64x128xf32>
    %23 = tpu.matmul %22, %15, %cst_13 {dimension_numbers = #tpu.dot_dimension_numbers<[1], [0], [0], [1], [0, 0, 1, 1], [], []>} : vector<64x16xbf16>, vector<16x128xbf16>, vector<64x128xf32> -> vector<64x128xf32>
    %c0_14 = arith.constant 0 : index
    %c0_15 = arith.constant 0 : index
    %c0_16 = arith.constant 0 : index
    %24 = vector.load %arg9[%c0_14, %c0_15, %c0_16] : memref<2x1x128xf32, #tpu.memory_space<vmem>>, vector<1x1x128xf32>
    %25 = vector.shape_cast %24 : vector<1x1x128xf32> to vector<1x128xf32>
    %26 = vector.broadcast %25 : vector<1x128xf32> to vector<64x128xf32>
    %27 = arith.mulf %23, %26 : vector<64x128xf32>
    %c0_17 = arith.constant 0 : index
    %c0_18 = arith.constant 0 : index
    %c0_19 = arith.constant 0 : index
    %28 = vector.load %arg10[%c0_17, %c0_18, %c0_19] : memref<2x1x128xf32, #tpu.memory_space<vmem>>, vector<1x1x128xf32>
    %29 = vector.shape_cast %28 : vector<1x1x128xf32> to vector<1x128xf32>
    %30 = vector.broadcast %29 : vector<1x128xf32> to vector<64x128xf32>
    %31 = arith.addf %27, %30 : vector<64x128xf32>
    %cst_20 = arith.constant 0.000000e+00 : f32
    %32 = vector.broadcast %cst_20 : f32 to vector<64x128xf32>
    %33 = arith.maximumf %31, %32 : vector<64x128xf32>
    %c9 = arith.constant 9 : index
    %c0_21 = arith.constant 0 : index
    %34 = vector.load %arg17[%c9, %c0_21] : memref<82x128xf32, #tpu.memory_space<vmem>>, vector<64x128xf32>
    tpu.vector_store %arg17[%c9, %c0_21], %33 {strides = array<i32>} : memref<82x128xf32, #tpu.memory_space<vmem>>, vector<64x128xf32>,
    %c0_22 = arith.constant 0 : index
    %c0_23 = arith.constant 0 : index
    %35 = vector.load %arg17[%c0_22, %c0_23] : memref<82x128xf32, #tpu.memory_space<vmem>>, vector<64x128xf32>
    %c0_i32 = arith.constant 0 : i32
    %36 = vector.broadcast %c0_i32 : i32 to vector<64x128xi32>
    %37 = arith.cmpi sge, %0, %36 : vector<64x128xi32>
    %c2_i32 = arith.constant 2 : i32
    %38 = vector.broadcast %c2_i32 : i32 to vector<64x128xi32>
    %39 = arith.cmpi slt, %0, %38 : vector<64x128xi32>
    %40 = arith.andi %37, %39 : vector<64x128xi1>
    %41 = arith.andi %40, %5 : vector<64x128xi1>
    %cst_24 = arith.constant 0.000000e+00 : f32
    %42 = vector.broadcast %cst_24 : f32 to vector<64x128xf32>
    %43 = arith.select %41, %35, %42 : vector<64x128xi1>, vector<64x128xf32>
    %c1 = arith.constant 1 : index
    %c0_25 = arith.constant 0 : index
    %44 = vector.load %arg17[%c1, %c0_25] : memref<82x128xf32, #tpu.memory_space<vmem>>, vector<64x128xf32>
    %c2_i32_26 = arith.constant 2 : i32
    %45 = vector.broadcast %c2_i32_26 : i32 to vector<64x128xi32>
    %46 = arith.cmpi sge, %0, %45 : vector<64x128xi32>
    %c4_i32 = arith.constant 4 : i32
    %47 = vector.broadcast %c4_i32 : i32 to vector<64x128xi32>
    %48 = arith.cmpi slt, %0, %47 : vector<64x128xi32>
    %49 = arith.andi %46, %48 : vector<64x128xi1>
    %cst_27 = arith.constant 0.000000e+00 : f32
    %50 = vector.broadcast %cst_27 : f32 to vector<64x128xf32>
    %51 = arith.select %49, %44, %50 : vector<64x128xi1>, vector<64x128xf32>
    %52 = arith.addf %43, %51 : vector<64x128xf32>
    %c2 = arith.constant 2 : index
    %c0_28 = arith.constant 0 : index
    %53 = vector.load %arg17[%c2, %c0_28] : memref<82x128xf32, #tpu.memory_space<vmem>>, vector<64x128xf32>
    %c4_i32_29 = arith.constant 4 : i32
    %54 = vector.broadcast %c4_i32_29 : i32 to vector<64x128xi32>
    %55 = arith.cmpi sge, %0, %54 : vector<64x128xi32>
    %c6_i32 = arith.constant 6 : i32
    %56 = vector.broadcast %c6_i32 : i32 to vector<64x128xi32>
    %57 = arith.cmpi slt, %0, %56 : vector<64x128xi32>
    %58 = arith.andi %55, %57 : vector<64x128xi1>
    %59 = arith.andi %58, %7 : vector<64x128xi1>
    %cst_30 = arith.constant 0.000000e+00 : f32
    %60 = vector.broadcast %cst_30 : f32 to vector<64x128xf32>
    %61 = arith.select %59, %53, %60 : vector<64x128xi1>, vector<64x128xf32>
    %62 = arith.addf %52, %61 : vector<64x128xf32>
    %c8 = arith.constant 8 : index
    %c0_31 = arith.constant 0 : index
    %63 = vector.load %arg17[%c8, %c0_31] : memref<82x128xf32, #tpu.memory_space<vmem>>, vector<64x128xf32>
    %c6_i32_32 = arith.constant 6 : i32
    %64 = vector.broadcast %c6_i32_32 : i32 to vector<64x128xi32>
    %65 = arith.cmpi sge, %0, %64 : vector<64x128xi32>
    %c8_i32 = arith.constant 8 : i32
    %66 = vector.broadcast %c8_i32 : i32 to vector<64x128xi32>
    %67 = arith.cmpi slt, %0, %66 : vector<64x128xi32>
    %68 = arith.andi %65, %67 : vector<64x128xi1>
    %69 = arith.andi %68, %5 : vector<64x128xi1>
    %cst_33 = arith.constant 0.000000e+00 : f32
    %70 = vector.broadcast %cst_33 : f32 to vector<64x128xf32>
    %71 = arith.select %69, %63, %70 : vector<64x128xi1>, vector<64x128xf32>
    %72 = arith.addf %62, %71 : vector<64x128xf32>
    %c9_34 = arith.constant 9 : index
    %c0_35 = arith.constant 0 : index
    %73 = vector.load %arg17[%c9_34, %c0_35] : memref<82x128xf32, #tpu.memory_space<vmem>>, vector<64x128xf32>
    %c8_i32_36 = arith.constant 8 : i32
    %74 = vector.broadcast %c8_i32_36 : i32 to vector<64x128xi32>
    %75 = arith.cmpi sge, %0, %74 : vector<64x128xi32>
    %c10_i32 = arith.constant 10 : i32
    %76 = vector.broadcast %c10_i32 : i32 to vector<64x128xi32>
    %77 = arith.cmpi slt, %0, %76 : vector<64x128xi32>
    %78 = arith.andi %75, %77 : vector<64x128xi1>
    %cst_37 = arith.constant 0.000000e+00 : f32
    %79 = vector.broadcast %cst_37 : f32 to vector<64x128xf32>
    %80 = arith.select %78, %73, %79 : vector<64x128xi1>, vector<64x128xf32>
    %81 = arith.addf %72, %80 : vector<64x128xf32>
    %c10 = arith.constant 10 : index
    %c0_38 = arith.constant 0 : index
    %82 = vector.load %arg17[%c10, %c0_38] : memref<82x128xf32, #tpu.memory_space<vmem>>, vector<64x128xf32>
    %c10_i32_39 = arith.constant 10 : i32
    %83 = vector.broadcast %c10_i32_39 : i32 to vector<64x128xi32>
    %84 = arith.cmpi sge, %0, %83 : vector<64x128xi32>
    %c12_i32 = arith.constant 12 : i32
    %85 = vector.broadcast %c12_i32 : i32 to vector<64x128xi32>
    %86 = arith.cmpi slt, %0, %85 : vector<64x128xi32>
    %87 = arith.andi %84, %86 : vector<64x128xi1>
    %88 = arith.andi %87, %7 : vector<64x128xi1>
    %cst_40 = arith.constant 0.000000e+00 : f32
    %89 = vector.broadcast %cst_40 : f32 to vector<64x128xf32>
    %90 = arith.select %88, %82, %89 : vector<64x128xi1>, vector<64x128xf32>
    %91 = arith.addf %81, %90 : vector<64x128xf32>
    %c16 = arith.constant 16 : index
    %c0_41 = arith.constant 0 : index
    %92 = vector.load %arg17[%c16, %c0_41] : memref<82x128xf32, #tpu.memory_space<vmem>>, vector<64x128xf32>
    %c12_i32_42 = arith.constant 12 : i32
    %93 = vector.broadcast %c12_i32_42 : i32 to vector<64x128xi32>
    %94 = arith.cmpi sge, %0, %93 : vector<64x128xi32>
    %c14_i32 = arith.constant 14 : i32
    %95 = vector.broadcast %c14_i32 : i32 to vector<64x128xi32>
    %96 = arith.cmpi slt, %0, %95 : vector<64x128xi32>
    %97 = arith.andi %94, %96 : vector<64x128xi1>
    %98 = arith.andi %97, %5 : vector<64x128xi1>
    %cst_43 = arith.constant 0.000000e+00 : f32
    %99 = vector.broadcast %cst_43 : f32 to vector<64x128xf32>
    %100 = arith.select %98, %92, %99 : vector<64x128xi1>, vector<64x128xf32>
    %101 = arith.addf %91, %100 : vector<64x128xf32>
    %c17 = arith.constant 17 : index
    %c0_44 = arith.constant 0 : index
    %102 = vector.load %arg17[%c17, %c0_44] : memref<82x128xf32, #tpu.memory_space<vmem>>, vector<64x128xf32>
    %c14_i32_45 = arith.constant 14 : i32
    %103 = vector.broadcast %c14_i32_45 : i32 to vector<64x128xi32>
    %104 = arith.cmpi sge, %0, %103 : vector<64x128xi32>
    %c16_i32 = arith.constant 16 : i32
    %105 = vector.broadcast %c16_i32 : i32 to vector<64x128xi32>
    %106 = arith.cmpi slt, %0, %105 : vector<64x128xi32>
    %107 = arith.andi %104, %106 : vector<64x128xi1>
    %cst_46 = arith.constant 0.000000e+00 : f32
    %108 = vector.broadcast %cst_46 : f32 to vector<64x128xf32>
    %109 = arith.select %107, %102, %108 : vector<64x128xi1>, vector<64x128xf32>
    %110 = arith.addf %101, %109 : vector<64x128xf32>
    %c18 = arith.constant 18 : index
    %c0_47 = arith.constant 0 : index
    %111 = vector.load %arg17[%c18, %c0_47] : memref<82x128xf32, #tpu.memory_space<vmem>>, vector<64x128xf32>
    %c16_i32_48 = arith.constant 16 : i32
    %112 = vector.broadcast %c16_i32_48 : i32 to vector<64x128xi32>
    %113 = arith.cmpi sge, %0, %112 : vector<64x128xi32>
    %c18_i32 = arith.constant 18 : i32
    %114 = vector.broadcast %c18_i32 : i32 to vector<64x128xi32>
    %115 = arith.cmpi slt, %0, %114 : vector<64x128xi32>
    %116 = arith.andi %113, %115 : vector<64x128xi1>
    %117 = arith.andi %116, %7 : vector<64x128xi1>
    %cst_49 = arith.constant 0.000000e+00 : f32
    %118 = vector.broadcast %cst_49 : f32 to vector<64x128xf32>
    %119 = arith.select %117, %111, %118 : vector<64x128xi1>, vector<64x128xf32>
    %120 = arith.addf %110, %119 : vector<64x128xf32>
    %121 = arith.truncf %120 : vector<64x128xf32> to vector<64x128xbf16>
    %c0_50 = arith.constant 0 : index
    %c0_51 = arith.constant 0 : index
    %c0_52 = arith.constant 0 : index
    %122 = vector.load %arg11[%c0_50, %c0_51, %c0_52] : memref<2x128x128xbf16, #tpu.memory_space<vmem>>, vector<1x128x128xbf16>
    %123 = vector.shape_cast %122 : vector<1x128x128xbf16> to vector<128x128xbf16>
    %cst_53 = arith.constant dense<0.000000e+00> : vector<64x128xf32>
    %124 = tpu.matmul %121, %123, %cst_53 {dimension_numbers = #tpu.dot_dimension_numbers<[1], [0], [0], [1], [0, 0, 1, 1], [], []>} : vector<64x128xbf16>, vector<128x128xbf16>, vector<64x128xf32> -> vector<64x128xf32>
    %c0_54 = arith.constant 0 : index
    %c0_55 = arith.constant 0 : index
    %c0_56 = arith.constant 0 : index
    %125 = vector.load %arg12[%c0_54, %c0_55, %c0_56] : memref<2x1x128xf32, #tpu.memory_space<vmem>>, vector<1x1x128xf32>
    %126 = vector.shape_cast %125 : vector<1x1x128xf32> to vector<1x128xf32>
    %127 = vector.broadcast %126 : vector<1x128xf32> to vector<64x128xf32>
    %128 = arith.mulf %124, %127 : vector<64x128xf32>
    %c0_57 = arith.constant 0 : index
    %c0_58 = arith.constant 0 : index
    %c0_59 = arith.constant 0 : index
    %129 = vector.load %arg13[%c0_57, %c0_58, %c0_59] : memref<2x1x128xf32, #tpu.memory_space<vmem>>, vector<1x1x128xf32>
    %130 = vector.shape_cast %129 : vector<1x1x128xf32> to vector<1x128xf32>
    %131 = vector.broadcast %130 : vector<1x128xf32> to vector<64x128xf32>
    %132 = arith.addf %128, %131 : vector<64x128xf32>
    %cst_60 = arith.constant 0.000000e+00 : f32
    %133 = vector.broadcast %cst_60 : f32 to vector<64x128xf32>
    %134 = arith.maximumf %132, %133 : vector<64x128xf32>
    %135 = arith.truncf %134 : vector<64x128xf32> to vector<64x128xbf16>
    %c0_61 = arith.constant 0 : index
    %c0_62 = arith.constant 0 : index
    %c0_63 = arith.constant 0 : index
    %136 = vector.load %arg14[%c0_61, %c0_62, %c0_63] : memref<2x128x128xbf16, #tpu.memory_space<vmem>>, vector<1x128x128xbf16>
    %137 = vector.shape_cast %136 : vector<1x128x128xbf16> to vector<128x128xbf16>
    %cst_64 = arith.constant dense<0.000000e+00> : vector<64x128xf32>
    %138 = tpu.matmul %135, %137, %cst_64 {dimension_numbers = #tpu.dot_dimension_numbers<[1], [0], [0], [1], [0, 0, 1, 1], [], []>} : vector<64x128xbf16>, vector<128x128xbf16>, vector<64x128xf32> -> vector<64x128xf32>
    %139 = arith.truncf %12 : vector<64x16xf32> to vector<64x16xbf16>
    %c0_65 = arith.constant 0 : index
    %c0_66 = arith.constant 0 : index
    %140 = vector.load %arg5[%c0_65, %c0_66] : memref<16x128xbf16, #tpu.memory_space<vmem>>, vector<16x128xbf16>
    %cst_67 = arith.constant dense<0.000000e+00> : vector<64x128xf32>
    %141 = tpu.matmul %139, %140, %cst_67 {dimension_numbers = #tpu.dot_dimension_numbers<[1], [0], [0], [1], [0, 0, 1, 1], [], []>} : vector<64x16xbf16>, vector<16x128xbf16>, vector<64x128xf32> -> vector<64x128xf32>
    %142 = arith.addf %138, %141 : vector<64x128xf32>
    %c0_68 = arith.constant 0 : index
    %c0_69 = arith.constant 0 : index
    %c0_70 = arith.constant 0 : index
    %143 = vector.load %arg6[%c0_68, %c0_69, %c0_70] : memref<1x1x128xf32, #tpu.memory_space<vmem>>, vector<1x1x128xf32>
    %144 = vector.shape_cast %143 : vector<1x1x128xf32> to vector<1x128xf32>
    %c0_71 = arith.constant 0 : index
    %c0_72 = arith.constant 0 : index
    %c0_73 = arith.constant 0 : index
    %145 = vector.load %arg7[%c0_71, %c0_72, %c0_73] : memref<1x1x128xf32, #tpu.memory_space<vmem>>, vector<1x1x128xf32>
    %146 = vector.shape_cast %145 : vector<1x1x128xf32> to vector<1x128xf32>
    %c0_74 = arith.constant 0 : index
    %c0_75 = arith.constant 0 : index
    %c0_76 = arith.constant 0 : index
    %147 = vector.load %arg8[%c0_74, %c0_75, %c0_76] : memref<1x128x128xbf16, #tpu.memory_space<vmem>>, vector<1x128x128xbf16>
    %148 = vector.shape_cast %147 : vector<1x128x128xbf16> to vector<128x128xbf16>
    %149 = vector.broadcast %144 : vector<1x128xf32> to vector<64x128xf32>
    %150 = arith.mulf %142, %149 : vector<64x128xf32>
    %151 = vector.broadcast %146 : vector<1x128xf32> to vector<64x128xf32>
    %152 = arith.addf %150, %151 : vector<64x128xf32>
    %cst_77 = arith.constant 0.000000e+00 : f32
    %153 = vector.broadcast %cst_77 : f32 to vector<64x128xf32>
    %154 = arith.maximumf %152, %153 : vector<64x128xf32>
    %155 = arith.truncf %154 : vector<64x128xf32> to vector<64x128xbf16>
    %cst_78 = arith.constant dense<0.000000e+00> : vector<64x128xf32>
    %156 = tpu.matmul %155, %148, %cst_78 {dimension_numbers = #tpu.dot_dimension_numbers<[1], [0], [0], [1], [0, 0, 1, 1], [], []>} : vector<64x128xbf16>, vector<128x128xbf16>, vector<64x128xf32> -> vector<64x128xf32>
    %c1_79 = arith.constant 1 : index
    %c0_80 = arith.constant 0 : index
    %c0_81 = arith.constant 0 : index
    %157 = vector.load %arg9[%c1_79, %c0_80, %c0_81] : memref<2x1x128xf32, #tpu.memory_space<vmem>>, vector<1x1x128xf32>
    %158 = vector.shape_cast %157 : vector<1x1x128xf32> to vector<1x128xf32>
    %159 = vector.broadcast %158 : vector<1x128xf32> to vector<64x128xf32>
    %160 = arith.mulf %156, %159 : vector<64x128xf32>
    %c1_82 = arith.constant 1 : index
    %c0_83 = arith.constant 0 : index
    %c0_84 = arith.constant 0 : index
    %161 = vector.load %arg10[%c1_82, %c0_83, %c0_84] : memref<2x1x128xf32, #tpu.memory_space<vmem>>, vector<1x1x128xf32>
    %162 = vector.shape_cast %161 : vector<1x1x128xf32> to vector<1x128xf32>
    %163 = vector.broadcast %162 : vector<1x128xf32> to vector<64x128xf32>
    %164 = arith.addf %160, %163 : vector<64x128xf32>
    %cst_85 = arith.constant 0.000000e+00 : f32
    %165 = vector.broadcast %cst_85 : f32 to vector<64x128xf32>
    %166 = arith.maximumf %164, %165 : vector<64x128xf32>
    %c9_86 = arith.constant 9 : index
    %c0_87 = arith.constant 0 : index
    %167 = vector.load %arg17[%c9_86, %c0_87] : memref<82x128xf32, #tpu.memory_space<vmem>>, vector<64x128xf32>
    tpu.vector_store %arg17[%c9_86, %c0_87], %166 {strides = array<i32>} : memref<82x128xf32, #tpu.memory_space<vmem>>, vector<64x128xf32>,
    %c0_88 = arith.constant 0 : index
    %c0_89 = arith.constant 0 : index
    %168 = vector.load %arg17[%c0_88, %c0_89] : memref<82x128xf32, #tpu.memory_space<vmem>>, vector<64x128xf32>
    %c0_i32_90 = arith.constant 0 : i32
    %169 = vector.broadcast %c0_i32_90 : i32 to vector<64x128xi32>
    %170 = arith.cmpi sge, %0, %169 : vector<64x128xi32>
    %c2_i32_91 = arith.constant 2 : i32
    %171 = vector.broadcast %c2_i32_91 : i32 to vector<64x128xi32>
    %172 = arith.cmpi slt, %0, %171 : vector<64x128xi32>
    %173 = arith.andi %170, %172 : vector<64x128xi1>
    %174 = arith.andi %173, %5 : vector<64x128xi1>
    %cst_92 = arith.constant 0.000000e+00 : f32
    %175 = vector.broadcast %cst_92 : f32 to vector<64x128xf32>
    %176 = arith.select %174, %168, %175 : vector<64x128xi1>, vector<64x128xf32>
    %c1_93 = arith.constant 1 : index
    %c0_94 = arith.constant 0 : index
    %177 = vector.load %arg17[%c1_93, %c0_94] : memref<82x128xf32, #tpu.memory_space<vmem>>, vector<64x128xf32>
    %c2_i32_95 = arith.constant 2 : i32
    %178 = vector.broadcast %c2_i32_95 : i32 to vector<64x128xi32>
    %179 = arith.cmpi sge, %0, %178 : vector<64x128xi32>
    %c4_i32_96 = arith.constant 4 : i32
    %180 = vector.broadcast %c4_i32_96 : i32 to vector<64x128xi32>
    %181 = arith.cmpi slt, %0, %180 : vector<64x128xi32>
    %182 = arith.andi %179, %181 : vector<64x128xi1>
    %cst_97 = arith.constant 0.000000e+00 : f32
    %183 = vector.broadcast %cst_97 : f32 to vector<64x128xf32>
    %184 = arith.select %182, %177, %183 : vector<64x128xi1>, vector<64x128xf32>
    %185 = arith.addf %176, %184 : vector<64x128xf32>
    %c2_98 = arith.constant 2 : index
    %c0_99 = arith.constant 0 : index
    %186 = vector.load %arg17[%c2_98, %c0_99] : memref<82x128xf32, #tpu.memory_space<vmem>>, vector<64x128xf32>
    %c4_i32_100 = arith.constant 4 : i32
    %187 = vector.broadcast %c4_i32_100 : i32 to vector<64x128xi32>
    %188 = arith.cmpi sge, %0, %187 : vector<64x128xi32>
    %c6_i32_101 = arith.constant 6 : i32
    %189 = vector.broadcast %c6_i32_101 : i32 to vector<64x128xi32>
    %190 = arith.cmpi slt, %0, %189 : vector<64x128xi32>
    %191 = arith.andi %188, %190 : vector<64x128xi1>
    %192 = arith.andi %191, %7 : vector<64x128xi1>
    %cst_102 = arith.constant 0.000000e+00 : f32
    %193 = vector.broadcast %cst_102 : f32 to vector<64x128xf32>
    %194 = arith.select %192, %186, %193 : vector<64x128xi1>, vector<64x128xf32>
    %195 = arith.addf %185, %194 : vector<64x128xf32>
    %c8_103 = arith.constant 8 : index
    %c0_104 = arith.constant 0 : index
    %196 = vector.load %arg17[%c8_103, %c0_104] : memref<82x128xf32, #tpu.memory_space<vmem>>, vector<64x128xf32>
    %c6_i32_105 = arith.constant 6 : i32
    %197 = vector.broadcast %c6_i32_105 : i32 to vector<64x128xi32>
    %198 = arith.cmpi sge, %0, %197 : vector<64x128xi32>
    %c8_i32_106 = arith.constant 8 : i32
    %199 = vector.broadcast %c8_i32_106 : i32 to vector<64x128xi32>
    %200 = arith.cmpi slt, %0, %199 : vector<64x128xi32>
    %201 = arith.andi %198, %200 : vector<64x128xi1>
    %202 = arith.andi %201, %5 : vector<64x128xi1>
    %cst_107 = arith.constant 0.000000e+00 : f32
    %203 = vector.broadcast %cst_107 : f32 to vector<64x128xf32>
    %204 = arith.select %202, %196, %203 : vector<64x128xi1>, vector<64x128xf32>
    %205 = arith.addf %195, %204 : vector<64x128xf32>
    %c9_108 = arith.constant 9 : index
    %c0_109 = arith.constant 0 : index
    %206 = vector.load %arg17[%c9_108, %c0_109] : memref<82x128xf32, #tpu.memory_space<vmem>>, vector<64x128xf32>
    %c8_i32_110 = arith.constant 8 : i32
    %207 = vector.broadcast %c8_i32_110 : i32 to vector<64x128xi32>
    %208 = arith.cmpi sge, %0, %207 : vector<64x128xi32>
    %c10_i32_111 = arith.constant 10 : i32
    %209 = vector.broadcast %c10_i32_111 : i32 to vector<64x128xi32>
    %210 = arith.cmpi slt, %0, %209 : vector<64x128xi32>
    %211 = arith.andi %208, %210 : vector<64x128xi1>
    %cst_112 = arith.constant 0.000000e+00 : f32
    %212 = vector.broadcast %cst_112 : f32 to vector<64x128xf32>
    %213 = arith.select %211, %206, %212 : vector<64x128xi1>, vector<64x128xf32>
    %214 = arith.addf %205, %213 : vector<64x128xf32>
    %c10_113 = arith.constant 10 : index
    %c0_114 = arith.constant 0 : index
    %215 = vector.load %arg17[%c10_113, %c0_114] : memref<82x128xf32, #tpu.memory_space<vmem>>, vector<64x128xf32>
    %c10_i32_115 = arith.constant 10 : i32
    %216 = vector.broadcast %c10_i32_115 : i32 to vector<64x128xi32>
    %217 = arith.cmpi sge, %0, %216 : vector<64x128xi32>
    %c12_i32_116 = arith.constant 12 : i32
    %218 = vector.broadcast %c12_i32_116 : i32 to vector<64x128xi32>
    %219 = arith.cmpi slt, %0, %218 : vector<64x128xi32>
    %220 = arith.andi %217, %219 : vector<64x128xi1>
    %221 = arith.andi %220, %7 : vector<64x128xi1>
    %cst_117 = arith.constant 0.000000e+00 : f32
    %222 = vector.broadcast %cst_117 : f32 to vector<64x128xf32>
    %223 = arith.select %221, %215, %222 : vector<64x128xi1>, vector<64x128xf32>
    %224 = arith.addf %214, %223 : vector<64x128xf32>
    %c16_118 = arith.constant 16 : index
    %c0_119 = arith.constant 0 : index
    %225 = vector.load %arg17[%c16_118, %c0_119] : memref<82x128xf32, #tpu.memory_space<vmem>>, vector<64x128xf32>
    %c12_i32_120 = arith.constant 12 : i32
    %226 = vector.broadcast %c12_i32_120 : i32 to vector<64x128xi32>
    %227 = arith.cmpi sge, %0, %226 : vector<64x128xi32>
    %c14_i32_121 = arith.constant 14 : i32
    %228 = vector.broadcast %c14_i32_121 : i32 to vector<64x128xi32>
    %229 = arith.cmpi slt, %0, %228 : vector<64x128xi32>
    %230 = arith.andi %227, %229 : vector<64x128xi1>
    %231 = arith.andi %230, %5 : vector<64x128xi1>
    %cst_122 = arith.constant 0.000000e+00 : f32
    %232 = vector.broadcast %cst_122 : f32 to vector<64x128xf32>
    %233 = arith.select %231, %225, %232 : vector<64x128xi1>, vector<64x128xf32>
    %234 = arith.addf %224, %233 : vector<64x128xf32>
    %c17_123 = arith.constant 17 : index
    %c0_124 = arith.constant 0 : index
    %235 = vector.load %arg17[%c17_123, %c0_124] : memref<82x128xf32, #tpu.memory_space<vmem>>, vector<64x128xf32>
    %c14_i32_125 = arith.constant 14 : i32
    %236 = vector.broadcast %c14_i32_125 : i32 to vector<64x128xi32>
    %237 = arith.cmpi sge, %0, %236 : vector<64x128xi32>
    %c16_i32_126 = arith.constant 16 : i32
    %238 = vector.broadcast %c16_i32_126 : i32 to vector<64x128xi32>
    %239 = arith.cmpi slt, %0, %238 : vector<64x128xi32>
    %240 = arith.andi %237, %239 : vector<64x128xi1>
    %cst_127 = arith.constant 0.000000e+00 : f32
    %241 = vector.broadcast %cst_127 : f32 to vector<64x128xf32>
    %242 = arith.select %240, %235, %241 : vector<64x128xi1>, vector<64x128xf32>
    %243 = arith.addf %234, %242 : vector<64x128xf32>
    %c18_128 = arith.constant 18 : index
    %c0_129 = arith.constant 0 : index
    %244 = vector.load %arg17[%c18_128, %c0_129] : memref<82x128xf32, #tpu.memory_space<vmem>>, vector<64x128xf32>
    %c16_i32_130 = arith.constant 16 : i32
    %245 = vector.broadcast %c16_i32_130 : i32 to vector<64x128xi32>
    %246 = arith.cmpi sge, %0, %245 : vector<64x128xi32>
    %c18_i32_131 = arith.constant 18 : i32
    %247 = vector.broadcast %c18_i32_131 : i32 to vector<64x128xi32>
    %248 = arith.cmpi slt, %0, %247 : vector<64x128xi32>
    %249 = arith.andi %246, %248 : vector<64x128xi1>
    %250 = arith.andi %249, %7 : vector<64x128xi1>
    %cst_132 = arith.constant 0.000000e+00 : f32
    %251 = vector.broadcast %cst_132 : f32 to vector<64x128xf32>
    %252 = arith.select %250, %244, %251 : vector<64x128xi1>, vector<64x128xf32>
    %253 = arith.addf %243, %252 : vector<64x128xf32>
    %254 = arith.truncf %253 : vector<64x128xf32> to vector<64x128xbf16>
    %c1_133 = arith.constant 1 : index
    %c0_134 = arith.constant 0 : index
    %c0_135 = arith.constant 0 : index
    %255 = vector.load %arg11[%c1_133, %c0_134, %c0_135] : memref<2x128x128xbf16, #tpu.memory_space<vmem>>, vector<1x128x128xbf16>
    %256 = vector.shape_cast %255 : vector<1x128x128xbf16> to vector<128x128xbf16>
    %cst_136 = arith.constant dense<0.000000e+00> : vector<64x128xf32>
    %257 = tpu.matmul %254, %256, %cst_136 {dimension_numbers = #tpu.dot_dimension_numbers<[1], [0], [0], [1], [0, 0, 1, 1], [], []>} : vector<64x128xbf16>, vector<128x128xbf16>, vector<64x128xf32> -> vector<64x128xf32>
    %c1_137 = arith.constant 1 : index
    %c0_138 = arith.constant 0 : index
    %c0_139 = arith.constant 0 : index
    %258 = vector.load %arg12[%c1_137, %c0_138, %c0_139] : memref<2x1x128xf32, #tpu.memory_space<vmem>>, vector<1x1x128xf32>
    %259 = vector.shape_cast %258 : vector<1x1x128xf32> to vector<1x128xf32>
    %260 = vector.broadcast %259 : vector<1x128xf32> to vector<64x128xf32>
    %261 = arith.mulf %257, %260 : vector<64x128xf32>
    %c1_140 = arith.constant 1 : index
    %c0_141 = arith.constant 0 : index
    %c0_142 = arith.constant 0 : index
    %262 = vector.load %arg13[%c1_140, %c0_141, %c0_142] : memref<2x1x128xf32, #tpu.memory_space<vmem>>, vector<1x1x128xf32>
    %263 = vector.shape_cast %262 : vector<1x1x128xf32> to vector<1x128xf32>
    %264 = vector.broadcast %263 : vector<1x128xf32> to vector<64x128xf32>
    %265 = arith.addf %261, %264 : vector<64x128xf32>
    %cst_143 = arith.constant 0.000000e+00 : f32
    %266 = vector.broadcast %cst_143 : f32 to vector<64x128xf32>
    %267 = arith.maximumf %265, %266 : vector<64x128xf32>
    %268 = arith.truncf %267 : vector<64x128xf32> to vector<64x128xbf16>
    %c1_144 = arith.constant 1 : index
    %c0_145 = arith.constant 0 : index
    %c0_146 = arith.constant 0 : index
    %269 = vector.load %arg14[%c1_144, %c0_145, %c0_146] : memref<2x128x128xbf16, #tpu.memory_space<vmem>>, vector<1x128x128xbf16>
    %270 = vector.shape_cast %269 : vector<1x128x128xbf16> to vector<128x128xbf16>
    %cst_147 = arith.constant dense<0.000000e+00> : vector<64x128xf32>
    %271 = tpu.matmul %268, %270, %cst_147 {dimension_numbers = #tpu.dot_dimension_numbers<[1], [0], [0], [1], [0, 0, 1, 1], [], []>} : vector<64x128xbf16>, vector<128x128xbf16>, vector<64x128xf32> -> vector<64x128xf32>
    %272 = arith.addf %271, %142 : vector<64x128xf32>
    %cst_148 = arith.constant 0.000000e+00 : f32
    %273 = vector.broadcast %cst_148 : f32 to vector<64x128xf32>
    %274 = tpu.concatenate %272, %273 in 0 : vector<64x128xf32>, vector<64x128xf32> -> vector<128x128xf32>
    %275 = tpu.transpose %274, [1, 0] : vector<128x128xf32> -> vector<128x128xf32>
    %276 = vector.extract_strided_slice %275 {offsets = [0, 0], sizes = [8, 128], strides = [1, 1]} : vector<128x128xf32> to vector<8x128xf32>
    %c0_149 = arith.constant 0 : index
    %c0_150 = arith.constant 0 : index
    %277 = vector.load %arg15[%c0_149, %c0_150] : memref<128x256xf32, #tpu.memory_space<vmem>>, vector<128x256xf32>
    %cst_151 = arith.constant dense<0.000000e+00> : vector<8x256xf32>
    %278 = tpu.matmul %276, %277, %cst_151 {dimension_numbers = #tpu.dot_dimension_numbers<[1], [0], [0], [1], [0, 0, 1, 1], [], []>} : vector<8x128xf32>, vector<128x256xf32>, vector<8x256xf32> -> vector<8x256xf32>
    %c0_152 = arith.constant 0 : index
    %c0_153 = arith.constant 0 : index
    %c0_154 = arith.constant 0 : index
    %279 = vector.load %arg16[%c0_152, %c0_153, %c0_154] : memref<1x8x256xf32, #tpu.memory_space<vmem>>, vector<1x8x256xf32>
    %280 = vector.shape_cast %279 : vector<1x8x256xf32> to vector<8x256xf32>
    %281 = vector.shape_cast %278 : vector<8x256xf32> to vector<1x8x256xf32>
    tpu.vector_store %arg16[%c0_152, %c0_153, %c0_154], %281 {strides = array<i32>} : memref<1x8x256xf32, #tpu.memory_space<vmem>>, vector<1x8x256xf32>,
    return
  }
  func.func @transform_0(%arg0: i32) -> (i32, i32, i32) {
    %c0_i32 = arith.constant 0 : i32
    %c0_i32_0 = arith.constant 0 : i32
    %c0_i32_1 = arith.constant 0 : i32
    return %arg0, %c0_i32, %c0_i32_0 : i32, i32, i32
  }
  func.func @transform_1(%arg0: i32) -> (i32, i32) {
    %c0_i32 = arith.constant 0 : i32
    %c0_i32_0 = arith.constant 0 : i32
    %c0_i32_1 = arith.constant 0 : i32
    return %c0_i32, %c0_i32_0 : i32, i32
  }
  func.func @transform_2(%arg0: i32) -> (i32, i32) {
    %c0_i32 = arith.constant 0 : i32
    %c0_i32_0 = arith.constant 0 : i32
    %c0_i32_1 = arith.constant 0 : i32
    return %c0_i32, %c0_i32_0 : i32, i32
  }
  func.func @transform_3(%arg0: i32) -> (i32, i32) {
    %c0_i32 = arith.constant 0 : i32
    %c0_i32_0 = arith.constant 0 : i32
    %c0_i32_1 = arith.constant 0 : i32
    return %c0_i32, %c0_i32_0 : i32, i32
  }
  func.func @transform_4(%arg0: i32) -> (i32, i32) {
    %c0_i32 = arith.constant 0 : i32
    %c0_i32_0 = arith.constant 0 : i32
    %c0_i32_1 = arith.constant 0 : i32
    return %c0_i32, %c0_i32_0 : i32, i32
  }
  func.func @transform_5(%arg0: i32) -> (i32, i32, i32) {
    %c0_i32 = arith.constant 0 : i32
    %c0_i32_0 = arith.constant 0 : i32
    %c0_i32_1 = arith.constant 0 : i32
    %c0_i32_2 = arith.constant 0 : i32
    return %c0_i32, %c0_i32_0, %c0_i32_1 : i32, i32, i32
  }
  func.func @transform_6(%arg0: i32) -> (i32, i32, i32) {
    %c0_i32 = arith.constant 0 : i32
    %c0_i32_0 = arith.constant 0 : i32
    %c0_i32_1 = arith.constant 0 : i32
    %c0_i32_2 = arith.constant 0 : i32
    return %c0_i32, %c0_i32_0, %c0_i32_1 : i32, i32, i32
  }
  func.func @transform_7(%arg0: i32) -> (i32, i32, i32) {
    %c0_i32 = arith.constant 0 : i32
    %c0_i32_0 = arith.constant 0 : i32
    %c0_i32_1 = arith.constant 0 : i32
    %c0_i32_2 = arith.constant 0 : i32
    return %c0_i32, %c0_i32_0, %c0_i32_1 : i32, i32, i32
  }
  func.func @transform_8(%arg0: i32) -> (i32, i32, i32) {
    %c0_i32 = arith.constant 0 : i32
    %c0_i32_0 = arith.constant 0 : i32
    %c0_i32_1 = arith.constant 0 : i32
    %c0_i32_2 = arith.constant 0 : i32
    return %c0_i32, %c0_i32_0, %c0_i32_1 : i32, i32, i32
  }
  func.func @transform_9(%arg0: i32) -> (i32, i32, i32) {
    %c0_i32 = arith.constant 0 : i32
    %c0_i32_0 = arith.constant 0 : i32
    %c0_i32_1 = arith.constant 0 : i32
    %c0_i32_2 = arith.constant 0 : i32
    return %c0_i32, %c0_i32_0, %c0_i32_1 : i32, i32, i32
  }
  func.func @transform_10(%arg0: i32) -> (i32, i32, i32) {
    %c0_i32 = arith.constant 0 : i32
    %c0_i32_0 = arith.constant 0 : i32
    %c0_i32_1 = arith.constant 0 : i32
    %c0_i32_2 = arith.constant 0 : i32
    return %c0_i32, %c0_i32_0, %c0_i32_1 : i32, i32, i32
  }
  func.func @transform_11(%arg0: i32) -> (i32, i32, i32) {
    %c0_i32 = arith.constant 0 : i32
    %c0_i32_0 = arith.constant 0 : i32
    %c0_i32_1 = arith.constant 0 : i32
    %c0_i32_2 = arith.constant 0 : i32
    return %c0_i32, %c0_i32_0, %c0_i32_1 : i32, i32, i32
  }
  func.func @transform_12(%arg0: i32) -> (i32, i32, i32) {
    %c0_i32 = arith.constant 0 : i32
    %c0_i32_0 = arith.constant 0 : i32
    %c0_i32_1 = arith.constant 0 : i32
    %c0_i32_2 = arith.constant 0 : i32
    return %c0_i32, %c0_i32_0, %c0_i32_1 : i32, i32, i32
  }
  func.func @transform_13(%arg0: i32) -> (i32, i32, i32) {
    %c0_i32 = arith.constant 0 : i32
    %c0_i32_0 = arith.constant 0 : i32
    %c0_i32_1 = arith.constant 0 : i32
    %c0_i32_2 = arith.constant 0 : i32
    return %c0_i32, %c0_i32_0, %c0_i32_1 : i32, i32, i32
  }
  func.func @transform_14(%arg0: i32) -> (i32, i32) {
    %c0_i32 = arith.constant 0 : i32
    %c0_i32_0 = arith.constant 0 : i32
    %c0_i32_1 = arith.constant 0 : i32
    return %c0_i32, %c0_i32_0 : i32, i32
  }
  func.func @transform_15(%arg0: i32) -> (i32, i32, i32) {
    %c0_i32 = arith.constant 0 : i32
    %c0_i32_0 = arith.constant 0 : i32
    %c0_i32_1 = arith.constant 0 : i32
    return %arg0, %c0_i32, %c0_i32_0 : i32, i32, i32
  }
}

</mosaic_0001>

<bundles_post_ra>
// kernel: tpu_custom_call.1
= control target key start
LH: loop header
LB: loop body
LE: loop exit
PB: predicated region body
PF: predicated region fallthrough
CT: control target
= control target key end

     0   :  { %s4854_s0 = inlined_call_operand.vmem [shape: f32[2,64,16], index: 0, kind: input, shape index: {}]   ;;  %s4855_s1 = inlined_call_operand.vmem [shape: f32[1,16], index: 1, kind: input, shape index: {}]   ;;  %s4856_s2 = inlined_call_operand.hbm [shape: f32[1,16], index: 2, kind: input, shape index: {}]   ;;  %s4857_s3 = inlined_call_operand.hbm [shape: bf16[16,128], index: 3, kind: input, shape index: {}]   ;;  %s4858_s4 = inlined_call_operand.hbm [shape: bf16[16,128], index: 4, kind: input, shape index: {}]   ;;  %s4859_s5 = inlined_call_operand.hbm [shape: f32[1,1,128], index: 5, kind: input, shape index: {}]   ;;  %s4860_s6 = inlined_call_operand.hbm [shape: f32[1,1,128], index: 6, kind: input, shape index: {}]   ;;  %s4861_s7 = inlined_call_operand.vmem [shape: bf16[1,128,128], index: 7, kind: input, shape index: {}]   ;;  %s4862_s8 = inlined_call_operand.vmem [shape: f32[2,1,128], index: 8, kind: input, shape index: {}]   ;;  %s4863_s9 = inlined_call_operand.vmem [shape: f32[2,1,128], index: 9, kind: input, shape index: {}]   ;;  %s4864_s10 = inlined_call_operand.vmem [shape: bf16[2,128,128], index: 10, kind: input, shape index: {}]   ;;  %s4865_s11 = inlined_call_operand.vmem [shape: f32[2,1,128], index: 11, kind: input, shape index: {}]   ;;  %s4866_s12 = inlined_call_operand.vmem [shape: f32[2,1,128], index: 12, kind: input, shape index: {}]   ;;  %s4867_s13 = inlined_call_operand.hbm [shape: bf16[2,128,128], index: 13, kind: input, shape index: {}]   ;;  %s4868_s14 = inlined_call_operand.hbm [shape: f32[128,256], index: 14, kind: input, shape index: {}]   ;;  %s4869_s15 = inlined_call_operand.hbm [shape: f32[2,8,256], index: 15, kind: output, shape index: {}]  }
   0x1   :  { %4961 = sst [smem:[#allocation40_spill]] %s4857_s3 }
   0x2   :  { %4962 = sst [smem:[#allocation41_spill]] %s4865_s11 }
   0x3   :  { %4963 = sst [smem:[#allocation42_spill]] %s4866_s12 }
   0x4   :  { %4964 = sst [smem:[#allocation43_spill]] %s4869_s15 }
   0x5   :  { %20 = vsyncpa [#allocation4], 0 }
   0x6   :  { %21 = vsyncpa [#allocation7], 0 }
   0x7   :  { %22 = vsyncpa [#allocation10], 0 }
   0x8   :  { %23 = vsyncpa [#allocation13], 0 }
   0x9   :  { %24 = vsyncpa [#allocation5], 0 }
   0xa   :  { %26 = vsyncpa [#allocation5 + $0x1], 0  ;;  %s3319_s18 = smov 0   ;;  %s3321_s19 = smov 0  }
   0xb   :  { %s3323_s20 = smov 0   ;;  %s3325_s21 = smov 0  }
   0xc LB: > { %4965 = sst [smem:[#allocation21_spill]] %s3212_s18  ;;  %s3340_s22 = sadd.s32 4294967295, %s3224_s21   ;;  %s3224_s21 = sphi %s3325_s21, %s5241_s21   ;;  %s3220_s20 = sphi %s3323_s20, %s5244_s20   ;;  %s3216_s19 = sphi %s3321_s19, %s5243_s19   ;;  %s3212_s18 = sphi %s3319_s18, %s5242_s18  }
   0xd   : > { %4966 = sst [smem:[#allocation22_spill]] %s3216_s19  ;;  %s2432_s23 = sadd.s32 4294967294, %s3224_s21  }
   0xe   : > { %4967 = sst [smem:[#allocation23_spill]] %s3220_s20  ;;  %s3344_s24 = sadd.s32 1, %s3224_s21  }
   0xf   : > { %4968 = sst [smem:[#allocation24_spill]] %s3224_s21  ;;  %s359_s25 = sadd.s32 1, %s3220_s20 }
  0x10   : > { %4969 = sst [smem:[#allocation25_spill]] %s3344_s24  ;;  %s356_s26 = ssub.s32 %s3224_s21, %s3344_s24 }
  0x11   : > { %p369_p0 = scmp.ne.s32.totalorder %s3220_s20, %s3216_s19  ;;  %p357_p1 = scmp.eq.s32.totalorder %s356_s26, 0 }
  0x12   : > { %p370_p2 = scmp.eq.s32.totalorder %s3340_s22, 1  ;;  %p375_p3 = scmp.ne.s32.totalorder %s3216_s19, %s3212_s18 }
  0x13   : > { %p376_p4 = scmp.eq.s32.totalorder %s2432_s23, 1  ;;  %p2433_p7 = scmp.ge.s32.totalorder %s3224_s21, 1 }
  0x14   : > { %s3355_s27 = scalar_select %p357_p1, %s3220_s20, %s359_s25  }
  0x15   : > { %p3357_p5 = por %p370_p2, %p369_p0  ;;  %p3361_p6 = por %p376_p4, %p375_p3 }
  0x16   : > { %4970 = sst [smem:[#allocation26_spill]] %s3355_s27  ;;  %p383_p8 = scmp.lt.s32.totalorder %s3224_s21, 3 }
  0x17   : > { %s4971_s28 = scalar_select %p3357_p5, 1, 0 }
  0x18   : > { %s4973_s29 = scalar_select %p3361_p6, 1, 0 }
  0x19   : > { %4972 = sst [smem:[#allocation27_spill]] %s4971_s28  ;;  %p4877_p9 = scmp.eq.s32.totalorder %s3340_s22, 0 }
  0x1a   : > { %4974 = sst [smem:[#allocation28_spill]] %s4973_s29  ;;  %p3368_p10 = pnand %p2433_p7, %p383_p8 }
  0x1b   : > { %s3226_s16 = smov [#allocation6]   ;;  %s3227_s25 = smov [#allocation9]  }
  0x1c   : > { %s4975_s30 = scalar_select %p3368_p10, 1, 0 }
  0x1d   : > { %s409_s17 = sshll.u32 %s3226_s16, 4  ;;  %p2822_p11 = pneg %p3368_p10  ;;  %s3374_s17 = int_to_ptr.vmem [resolvable:$true] %s409_s17 }
  0x1e   : > { %s436_s26 = sshll.u32 %s3227_s25, 4  ;;  %s3228_s27 = smov [#allocation12]   ;;  %s3382_s26 = int_to_ptr.vmem [resolvable:$true] %s436_s26 }
  0x1f   : > { %p3378_p12 = pnand %p4877_p9, %p2822_p11  ;;  %s3384_s20 = sshll.u32 %s3228_s27, 4  ;;  %s476_s20 = int_to_ptr.vmem [resolvable:$true] %s3384_s20 }
  0x20   : > { %s4977_s3 = sld [smem:[#allocation40_spill]] }
  0x21   : > { %p3394_p0 = pneg %p3378_p12 }
  0x26   : > { %s2950_s16 = scalar_lea.hbm %s4977_s3, 128 }
  0x27   : > { %p2951_p13 = scmp.ne.s32.totalorder %s4977_s3, %s2950_s16  ;;  %p2957_p3 = scmp.lt.u32.totalorder %s2950_s16, %s4977_s3 }
  0x29   : > { %p2953_p1 = pnand %p3394_p0, %p2951_p13 }
  0x2b   : > { %p2954_p2 = pneg %p2953_p1 }
  0x2d   : > { %p2959_p4 = pnand %p2957_p3, %p2954_p2 }
  0x2f   : > { %2962 = shalt.err (!%p2959_p4)
}
  0x30   : > { %s2963_s18 = scalar_lea.vmem %s3374_s17, 128  ;;  %p2971_p9 = scmp.lt.s32.totalorder %s3374_s17, %s3374_s17 }
  0x31   : > { %p2964_p7 = scmp.ne.s32.totalorder %s3374_s17, %s2963_s18  ;;  %p2972_p6 = scmp.lt.s32.totalorder %s2963_s18, %s2963_s18 }
  0x33   : > { %p2966_p8 = pnand %p2964_p7, %p3394_p0  ;;  %p2973_p13 = por %p2972_p6, %p2971_p9 }
  0x35   : > { %p2967_p11 = pneg %p2966_p8 }
  0x37   : > { %p2974_p1 = pnand %p2973_p13, %p2967_p11 }
  0x39   : > { %2977 = shalt.err (!%p2974_p1)
}
  0x3a   : > { %s3229_s21 = smov 64   ;;  %s3230_s24 = smov 4  }
  0x3b   : > { %2828 = dma.hbm_to_vmem [thread:$0]  (!%p3378_p12), %s4977_s3, 128, %s3374_s17, [#allocation7], %s3229_s21, %s3229_s21, %s3230_s24  }
  0x3c   : > { %s2978_s18 = scalar_lea.hbm %s4859_s5, 16 }
  0x3d   : > { %p2979_p6 = scmp.ne.s32.totalorder %s4859_s5, %s2978_s18  ;;  %p2985_p3 = scmp.lt.u32.totalorder %s2978_s18, %s4859_s5 }
  0x3f   : > { %p2981_p9 = pnand %p2979_p6, %p3394_p0 }
  0x41   : > { %p2982_p2 = pneg %p2981_p9 }
  0x43   : > { %p2987_p4 = pnand %p2985_p3, %p2982_p2 }
  0x45   : > { %2990 = shalt.err (!%p2987_p4)
}
  0x46   : > { %s2991_s17 = scalar_lea.vmem %s3382_s26, 16  ;;  %s2998_s19 = scalar_lea.vmem %s3382_s26, 32 }
  0x47   : > { %p2992_p7 = scmp.ne.s32.totalorder %s3382_s26, %s2991_s17  ;;  %p2999_p13 = scmp.lt.s32.totalorder %s3382_s26, %s3382_s26 }
  0x48   : > { %p3000_p1 = scmp.lt.s32.totalorder %s2998_s19, %s2991_s17 }
  0x49   : > { %p2994_p8 = pnand %p2992_p7, %p3394_p0 }
  0x4a   : > { %p3001_p6 = por %p3000_p1, %p2999_p13 }
  0x4b   : > { %p2995_p11 = pneg %p2994_p8 }
  0x4d   : > { %p3002_p9 = pnand %p3001_p6, %p2995_p11 }
  0x4f   : > { %3005 = shalt.err (!%p3002_p9)
}
  0x50   : > { %2834 = dma.hbm_to_vmem [thread:$0]  (!%p3378_p12), %s4859_s5, 16, %s3382_s26, [#allocation10]  }
  0x51   : > { %s3006_s16 = scalar_lea.hbm %s4867_s13, 2048 }
  0x52   : > { %p3007_p2 = scmp.ne.s32.totalorder %s4867_s13, %s3006_s16  ;;  %p3013_p7 = scmp.lt.u32.totalorder %s3006_s16, %s4867_s13 }
  0x54   : > { %p3009_p3 = pnand %p3007_p2, %p3394_p0 }
  0x56   : > { %p3010_p4 = pneg %p3009_p3 }
  0x58   : > { %p3015_p8 = pnand %p3013_p7, %p3010_p4 }
  0x5a   : > { %3018 = shalt.err (!%p3015_p8)
}
  0x5b   : > { %s3019_s19 = scalar_lea.vmem %s476_s20, 2048  ;;  %p3027_p6 = scmp.lt.s32.totalorder %s476_s20, %s476_s20 }
  0x5c   : > { %p3020_p11 = scmp.ne.s32.totalorder %s476_s20, %s3019_s19  ;;  %p3028_p9 = scmp.lt.s32.totalorder %s3019_s19, %s3019_s19 }
  0x5e   : > { %p3022_p13 = pnand %p3020_p11, %p3394_p0  ;;  %p3029_p5 = por %p3028_p9, %p3027_p6 }
  0x60   : > { %p3023_p1 = pneg %p3022_p13 }
  0x62   : > { %p3030_p10 = pnand %p3029_p5, %p3023_p1 }
  0x64   : > { %3033 = shalt.err (!%p3030_p10)
}
  0x65   : > { %2840 = dma.hbm_to_vmem [thread:$0]  (!%p3378_p12), %s4867_s13, 2048, %s476_s20, [#allocation13], %s3229_s21, %s3229_s21, %s3230_s24  }
  0x66   : > { %s3231_s12 = smov [#allocation3]   ;;  %s3232_s29 = smov [#allocation8]  }
  0x67   : > { %s399_s28 = sshll.u32 %s3231_s12, 4  ;;  %s422_s16 = sshll.u32 %s3232_s29, 4  ;;  %s400_s28 = int_to_ptr.vmem [resolvable:$true] %s399_s28  ;;  %s423_s16 = int_to_ptr.vmem [resolvable:$true] %s422_s16 }
  0x68   : > { %s3034_s18 = scalar_lea.hbm %s4856_s2, 16 }
  0x69   : > { %p3035_p5 = scmp.ne.s32.totalorder %s4856_s2, %s3034_s18  ;;  %p3041_p3 = scmp.lt.u32.totalorder %s3034_s18, %s4856_s2 }
  0x6b   : > { %p3037_p10 = pnand %p3035_p5, %p3394_p0 }
  0x6d   : > { %p3038_p2 = pneg %p3037_p10 }
  0x6f   : > { %p3043_p4 = pnand %p3041_p3, %p3038_p2 }
  0x71   : > { %3046 = shalt.err (!%p3043_p4)
}
  0x72   : > { %s3047_s20 = scalar_lea.vmem %s400_s28, 16  ;;  %s3054_s11 = scalar_lea.vmem %s400_s28, 32 }
  0x73   : > { %p3048_p7 = scmp.ne.s32.totalorder %s400_s28, %s3047_s20  ;;  %p3055_p13 = scmp.lt.s32.totalorder %s400_s28, %s400_s28 }
  0x74   : > { %p3056_p1 = scmp.lt.s32.totalorder %s3054_s11, %s3047_s20 }
  0x75   : > { %p3050_p8 = pnand %p3048_p7, %p3394_p0 }
  0x76   : > { %p3057_p6 = por %p3056_p1, %p3055_p13 }
  0x77   : > { %p3051_p11 = pneg %p3050_p8 }
  0x79   : > { %p3058_p9 = pnand %p3057_p6, %p3051_p11 }
  0x7b   : > { %3061 = shalt.err (!%p3058_p9)
}
  0x7c   : > { %2825 = dma.hbm_to_vmem [thread:$0]  (!%p3378_p12), %s4856_s2, 16, %s400_s28, [#allocation4]  }
  0x7d   : > { %s3062_s27 = scalar_lea.hbm %s4858_s4, 128 }
  0x7e   : > { %p3063_p5 = scmp.ne.s32.totalorder %s4858_s4, %s3062_s27  ;;  %p3069_p3 = scmp.lt.u32.totalorder %s3062_s27, %s4858_s4 }
  0x80   : > { %p3065_p10 = pnand %p3063_p5, %p3394_p0 }
  0x82   : > { %p3066_p2 = pneg %p3065_p10 }
  0x84   : > { %p3071_p4 = pnand %p3069_p3, %p3066_p2 }
  0x86   : > { %3074 = shalt.err (!%p3071_p4)
}
  0x87   : > { %s3075_s20 = scalar_lea.vmem %s423_s16, 128  ;;  %p3083_p13 = scmp.lt.s32.totalorder %s423_s16, %s423_s16 }
  0x88   : > { %p3076_p7 = scmp.ne.s32.totalorder %s423_s16, %s3075_s20  ;;  %p3084_p1 = scmp.lt.s32.totalorder %s3075_s20, %s3075_s20 }
  0x8a   : > { %p3078_p8 = pnand %p3076_p7, %p3394_p0  ;;  %p3085_p6 = por %p3084_p1, %p3083_p13 }
  0x8c   : > { %p3079_p11 = pneg %p3078_p8 }
  0x8e   : > { %p3086_p9 = pnand %p3085_p6, %p3079_p11 }
  0x90   : > { %3089 = shalt.err (!%p3086_p9)
}
  0x91   : > { %2831 = dma.hbm_to_vmem [thread:$0]  (!%p3378_p12), %s4858_s4, 128, %s423_s16, [#allocation7], %s3229_s21, %s3229_s21, %s3230_s24  }
  0x92   : > { %s3233_s12 = smov [#allocation11]   ;;  %s3234_s3 = smov [#allocation14]  }
  0x93   : > { %s447_s29 = sshll.u32 %s3233_s12, 4  ;;  %s488_s25 = sshll.u32 %s3234_s3, 4  ;;  %s448_s29 = int_to_ptr.vmem [resolvable:$true] %s447_s29  ;;  %s489_s25 = int_to_ptr.vmem [resolvable:$true] %s488_s25 }
  0x94   : > { %s3090_s17 = scalar_lea.hbm %s4860_s6, 16 }
  0x95   : > { %p3091_p5 = scmp.ne.s32.totalorder %s4860_s6, %s3090_s17  ;;  %p3097_p3 = scmp.lt.u32.totalorder %s3090_s17, %s4860_s6 }
  0x97   : > { %p3093_p10 = pnand %p3091_p5, %p3394_p0 }
  0x99   : > { %p3094_p2 = pneg %p3093_p10 }
  0x9b   : > { %p3099_p4 = pnand %p3097_p3, %p3094_p2 }
  0x9d   : > { %3102 = shalt.err (!%p3099_p4)
}
  0x9e   : > { %s3103_s21 = scalar_lea.vmem %s448_s29, 16  ;;  %s3110_s24 = scalar_lea.vmem %s448_s29, 32 }
  0x9f   : > { %p3104_p7 = scmp.ne.s32.totalorder %s448_s29, %s3103_s21  ;;  %p3111_p13 = scmp.lt.s32.totalorder %s448_s29, %s448_s29 }
  0xa0   : > { %p3112_p1 = scmp.lt.s32.totalorder %s3110_s24, %s3103_s21 }
  0xa1   : > { %p3106_p8 = pnand %p3104_p7, %p3394_p0 }
  0xa2   : > { %p3113_p6 = por %p3112_p1, %p3111_p13 }
  0xa3   : > { %p3107_p11 = pneg %p3106_p8 }
  0xa5   : > { %p3114_p9 = pnand %p3113_p6, %p3107_p11 }
  0xa7   : > { %3117 = shalt.err (!%p3114_p9)
}
  0xa8   : > { %2837 = dma.hbm_to_vmem [thread:$0]  (!%p3378_p12), %s4860_s6, 16, %s448_s29, [#allocation10]  }
  0xa9   : > { %s3118_s27 = scalar_lea.hbm %s4868_s14, 4096 }
  0xaa   : > { %p3119_p5 = scmp.ne.s32.totalorder %s4868_s14, %s3118_s27  ;;  %p3125_p3 = scmp.lt.u32.totalorder %s3118_s27, %s4868_s14 }
  0xac   : > { %p3121_p10 = pnand %p3119_p5, %p3394_p0 }
  0xae   : > { %p3122_p2 = pneg %p3121_p10 }
  0xb0   : > { %p3127_p4 = pnand %p3125_p3, %p3122_p2 }
  0xb2   : > { %3130 = shalt.err (!%p3127_p4)
}
  0xb3   : > { %s3131_s20 = scalar_lea.vmem %s489_s25, 4096  ;;  %p3139_p13 = scmp.lt.s32.totalorder %s489_s25, %s489_s25 }
  0xb4   : > { %p3132_p7 = scmp.ne.s32.totalorder %s489_s25, %s3131_s20  ;;  %p3140_p1 = scmp.lt.s32.totalorder %s3131_s20, %s3131_s20 }
  0xb6   : > { %p3134_p8 = pnand %p3132_p7, %p3394_p0  ;;  %p3141_p6 = por %p3140_p1, %p3139_p13 }
  0xb8   : > { %p3135_p11 = pneg %p3134_p8 }
  0xba   : > { %p3142_p9 = pnand %p3141_p6, %p3135_p11 }
  0xbc   : > { %3145 = shalt.err (!%p3142_p9)
}
  0xbd   : > { %s3235_s29 = smov 256   ;;  %s3236_s28 = smov 16  }
  0xbe   : > { %2843 = dma.hbm_to_vmem [thread:$0]  (!%p3378_p12), %s4868_s14, 4096, %s489_s25, [#allocation13], %s3235_s29, %s3235_s29, %s3236_s28  }
  0xbf   : > { %p4979_p5 = scmp.ne.s32.totalorder %s4975_s30, 0 }
  0xc1   : > { %512 = sbr.rel (%p4979_p5) target bundleno = 1993 (0x7c9), region = 80 }
  0xc8   : > { %p4980_p10 = scmp.eq.s32.totalorder %s3340_s22, 0 }
  0xca   : > { %3191 = dma.done.wait (%p4980_p10), [#allocation4], 16   ;;  %p4981_p0 = pmov %p4980_p10 }
  0xcc   : > { %3193 = vsyncadd (%p4981_p0), [#allocation4], 4294967280  ;;  %p4982_p2 = pmov %p4981_p0 }
  0xcd   : > { %p4983_p3 = pmov %p4981_p0 }
  0xce   : > { %3195 = dma.done.wait (%p4982_p2), [#allocation7], 256  }
  0xcf   : > { %3197 = vsyncadd (%p4983_p3), [#allocation7], 4294967040  ;;  %p4984_p4 = pmov %p4981_p0 }
  0xd0   : > { %p4985_p12 = pmov %p4981_p0 }
  0xd1   : > { %3199 = dma.done.wait (%p4984_p4), [#allocation10], 32  }
  0xd2   : > { %3201 = vsyncadd (%p4985_p12), [#allocation10], 4294967264  ;;  %p4986_p7 = pmov %p4981_p0 }
  0xd3   : > { %p4987_p8 = pmov %p4981_p0 }
  0xd4   : > { %3203 = dma.done.wait (%p4986_p7), [#allocation13], 6144  }
  0xd5   : > { %3205 = vsyncadd (%p4987_p8), [#allocation13], 4294961152  ;;  %p584_p11 = scmp.lt.s32.totalorder %s3340_s22, 1  ;;  %v2907_v0 = vld [vmem:[#allocation6] sm:$0xff]   ;;  %v2454_v4 = vld [vmem:[#allocation3] ss:$0 sm:$0xff]  ;;  %v590_v56 = vlaneseq }
  0xd6   : > { %v2453_v3 = vld [vmem:[%s4855_s1] ss:$0 sm:$0xff]  ;;  %2612 = vmatprep.subr.bf16.mxu1 %v2907_v0  ;;  %vm4885_vm0 = vcmask 130048   ;;  %v3237_v40 = vmov 0.0   ;;  %v2909_v41 = vld [vmem:[%s4864_s10 + $0x8] sm:$0xff]   ;;  %v2910_v42 = vld [vmem:[%s4864_s10 + $0x10] sm:$0xff]  }
  0xd7   : > { %s585_s15 = scalar_select %p584_p11, %s3340_s22, 1  ;;  %2613 = vmatpush3.bf16.msra.mxu1 %v2907_v0  ;;  %v2908_v39 = vld [vmem:[%s4864_s10] sm:$0xff]   ;;  %625 = vst [vmem:[#allocation2] sm:$0xff] %v3237_v40  ;;  %626 = vst [vmem:[#allocation2 + $0x8] sm:$0x1] %v3237_v40  ;;  %v2911_v43 = vld [vmem:[%s4864_s10 + $0x18] sm:$0xff]  }
  0xd8   : > { %2622 = vmatprep.subr.bf16.mxu1 %v2908_v39  ;;  %627 = vst [vmem:[#allocation2 + $0x49] sm:$0xff] %v3237_v40  ;;  %628 = vst [vmem:[#allocation2 + $0x51] sm:$0x1] %v3237_v40  ;;  %v2912_v44 = vld [vmem:[%s4864_s10 + $0x20] sm:$0xff]   ;;  %v2913_v45 = vld [vmem:[%s4864_s10 + $0x28] sm:$0xff]   ;;  %v3623_v57 = vshrl.u32 %v590_v56, 7 }
  0xd9   : > { %s2540_s30 = sshll.u32 %s585_s15, 6  ;;  %v2914_v46 = vld [vmem:[%s4864_s10 + $0x30] sm:$0xff]   ;;  %v2915_v47 = vld [vmem:[%s4864_s10 + $0x38] sm:$0xff]   ;;  %v2916_v48 = vld [vmem:[#allocation8] sm:$0xff]   ;;  %v3627_v60 = vand.u32 127, %v590_v56  ;;  %v4988_v63 = vmov 0 }
  0xda   : > { %s588_s16 = scalar_lea.vmem %s4854_s0, %s2540_s30  ;;  %v2917_v50 = vld [vmem:[#allocation12] sm:$0xff]   ;;  %2646 = vmatprep.subr.bf16.mxu0 %v2916_v48  ;;  %v2918_v52 = vld [vmem:[#allocation12 + $0x8] sm:$0xff]   ;;  %v2919_v53 = vld [vmem:[#allocation12 + $0x10] sm:$0xff]   ;;  %v601_v58 = vand.u32 7, %v3623_v57  ;;  %v594_v59 = vadd.s32 8, %v3623_v57  ;;  %v595_v61 = vadd.s32 16, %v3623_v57 }
  0xdb   : > { %v3562_v1 = vld [vmem:[%s588_s16] sm:$0xff]  ;;  %v3564_v2 = vld [vmem:[%s588_s16 + $0x8] sm:$0xff]  ;;  %v3571_v7 = vld [vmem:[%s588_s16 + $0x10] sm:$0xff]  ;;  %2647 = vmatpush3.bf16.msra.mxu0 %v2916_v48  ;;  %v3631_v62 = vadd.s32 24, %v3623_v57  ;;  %vm846_vm3 = vcmp.ge.s32.totalorder %v3627_v60, 2  ;;  %vm847_vm4 = vcmp.lt.s32.totalorder %v3627_v60, 4 }
  0xdc   : > { %v647_v5 = vmul.f32 %v2453_v3, %v3562_v1  ;;  %v648_v6 = vmul.f32 %v2453_v3, %v3564_v2  ;;  %v3573_v8 = vld [vmem:[%s588_s16 + $0x18] sm:$0xff]  ;;  %v649_v9 = vmul.f32 %v2453_v3, %v3571_v7  ;;  %v3577_v11 = vld [vmem:[%s588_s16 + $0x20] sm:$0xff]  ;;  %v3579_v12 = vld [vmem:[%s588_s16 + $0x28] sm:$0xff]  ;;  %v1250_v49 = vpack.c.bf16 %v3564_v2, %v3562_v1  ;;  %2656 = vmatprep.subr.bf16.mxu0 %v2917_v50  ;;  %s5145_s25 = sld [smem:[#allocation41_spill]]  ;;  %s5146_s12 = sld [smem:[#allocation42_spill]] }
  0xdd   : > { %v650_v10 = vmul.f32 %v2453_v3, %v3573_v8  ;;  %v3581_v13 = vld [vmem:[%s588_s16 + $0x30] sm:$0xff]  ;;  %v651_v16 = vmul.f32 %v2453_v3, %v3577_v11  ;;  %v652_v17 = vmul.f32 %v2453_v3, %v3579_v12  ;;  %v3585_v18 = vld [vmem:[%s588_s16 + $0x38] sm:$0xff]  ;;  %v1251_v51 = vpack.c.bf16 %v3573_v8, %v3571_v7  ;;  %v2920_v54 = vld [vmem:[#allocation12 + $0x18] sm:$0xff]   ;;  %s5229_s16 = sld [smem:[#allocation22_spill]]  ;;  %s5234_s11 = sld [smem:[#allocation27_spill]] }
  0xde   : > { %v661_v14 = vadd.f32 %v2454_v4, %v647_v5  ;;  %v662_v15 = vadd.f32 %v2454_v4, %v648_v6  ;;  %v663_v19 = vadd.f32 %v2454_v4, %v649_v9  ;;  %v653_v21 = vmul.f32 %v2453_v3, %v3581_v13  ;;  %2648 = vmatprep.mubr.msk.bf16.mxu0 %vm4885_vm0, %v1250_v49  ;;  %v2921_v55 = vld [vmem:[#allocation12 + $0x20] sm:$0xff]   ;;  %v3643_v2 = vld [vmem:[%s4862_s8] ss:$0 sm:$0xff]  ;;  %vm3667_vm13 = vmand %vm846_vm3, %vm847_vm4  ;;  %s2541_s19 = sshll.u32 %s3340_s22, 8  ;;  %s5235_s29 = sld [smem:[#allocation43_spill]] }
  0xdf   : > { %v664_v20 = vadd.f32 %v2454_v4, %v650_v10  ;;  %v654_v22 = vmul.f32 %v2453_v3, %v3585_v18  ;;  %v665_v25 = vadd.f32 %v2454_v4, %v651_v16  ;;  %v666_v26 = vadd.f32 %v2454_v4, %v652_v17  ;;  %2649 = vmatmul.mubr.msk.bf16.vlgmr.msra.gmra.mrb[0].mxu0 %vm4885_vm0, %v1251_v51  ;;  %v3651_v5 = vld [vmem:[%s4863_s9] ss:$0 sm:$0xff]  ;;  %s3238_s22 = smov [#allocation15]  }
  0xe0   : > { %v669_v23 = vmax.f32 %v661_v14, 0.0  ;;  %v670_v24 = vmax.f32 %v662_v15, 0.0  ;;  %v671_v27 = vmax.f32 %v663_v19, 0.0  ;;  %v667_v29 = vadd.f32 %v2454_v4, %v653_v21  ;;  %2657 = vmatpush3.bf16.msra.mxu0 %v2917_v50  ;;  %s3150_s15 = sshll.u32 %s3238_s22, 4  ;;  %s3151_s15 = int_to_ptr.vmem [resolvable:$false] %s3150_s15 }
  0xe1   : > { %v672_v28 = vmax.f32 %v664_v20, 0.0  ;;  %v668_v30 = vadd.f32 %v2454_v4, %v654_v22  ;;  %v673_v32 = vmax.f32 %v665_v25, 0.0  ;;  %v674_v33 = vmax.f32 %v666_v26, 0.0  ;;  %2658 = vmatprep.subr.bf16.mxu0 %v2918_v52  ;;  %v838_v4 = vld [vmem:[#allocation2 + $0x1] sm:$0xff]  ;;  %s3152_s30 = scalar_lea.vmem %s3151_s15, 512 }
  0xe2   : > { %v677_v31 = vpack.c.bf16 %v670_v24, %v669_v23  ;;  %v675_v35 = vmax.f32 %v667_v29, 0.0  ;;  %vm3633_vm1 = vcmp.ge.s32.totalorder %v601_v58, 1  ;;  %v602_v0 = vand.u32 7, %v594_v59 }
  0xe3   : > { %v678_v34 = vpack.c.bf16 %v672_v28, %v671_v27  ;;  %v676_v36 = vmax.f32 %v668_v30, 0.0  ;;  %v679_v37 = vpack.c.bf16 %v674_v33, %v673_v32  ;;  %v4989_v63 = vsel %vm3633_vm1, 4294967295, %v4988_v63  ;;  %s581_s3 = sand.u32 1, %s5229_s16   ;;  %p5236_p1 = scmp.ne.s32.totalorder %s5234_s11, 0 }
  0xe4   : > { %2614 = vmatprep.mubr.msk.bf16.mxu1 %vm4885_vm0, %v677_v31  ;;  %2659 = vmatpush3.bf16.msra.mxu0 %v2918_v52  ;;  %v603_v1 = vand.u32 7, %v595_v61  ;;  %v604_v3 = vand.u32 7, %v3631_v62  ;;  %vm929_vm5 = vcmp.ge.s32.totalorder %v3627_v60, 8  ;;  %vm930_vm6 = vcmp.lt.s32.totalorder %v3627_v60, 10  ;;  %s2450_s27 = sshll.u32 %s581_s3, 4  ;;  %s4814_s28 = scalar_lea.hbm %s5235_s29, %s2541_s19 }
  0xe5   : > { %2615 = vmatmul.mubr.msk.bf16.vlgmr.msra.gmra.mrb[0].mxu1 %vm4885_vm0, %v678_v34  ;;  %v680_v38 = vpack.c.bf16 %v676_v36, %v675_v35  ;;  %2660 = vmatprep.subr.bf16.mxu0 %v2919_v53  ;;  %vm873_vm7 = vcmp.ge.s32.totalorder %v3627_v60, 4  ;;  %vm874_vm8 = vcmp.lt.s32.totalorder %v3627_v60, 6  ;;  %vm3657_vm11 = vcmp.ge.s32.totalorder %v602_v0, 1  ;;  %vm3686_vm3 = vmand %vm929_vm5, %vm930_vm6  ;;  %s583_s18 = scalar_lea.vmem [#allocation15], %s2450_s27  ;;  %s2290_s21 = scalar_lea.sflag [#allocation5], %s581_s3 }
  0xe6   : > { %2618 = vmatprep.mubr.msk.bf16.mxu1 %vm4885_vm0, %v679_v37  ;;  %2623 = vmatpush3.bf16.msra.mxu1 %v2908_v39  ;;  %v4990_v7 = vmov 0  ;;  %vm3661_vm12 = vcmp.lt.s32.totalorder %v601_v58, 7  ;;  %v4992_v8 = vmov 0  ;;  %v4994_v9 = vmov 0  ;;  %vm3709_vm5 = vmand %vm873_vm7, %vm874_vm8  ;;  %s2304_s17 = sshll.u32 %s583_s18, 4  ;;  %s4809_s17 = int_to_ptr.vmem [resolvable:$true] %s2304_s17 }
  0xe7   : > { %2624 = vmatprep.subr.bf16.mxu1 %v2909_v41  ;;  %v4991_v7 = vsel %vm3657_vm11, 4294967295, %v4990_v7  ;;  %v4993_v8 = vsel %vm3661_vm12, 4294967295, %v4992_v8  ;;  %v4995_v9 = vsel %vm3667_vm13, 4294967295, %v4994_v9  ;;  %vm901_vm14 = vcmp.ge.s32.totalorder %v3627_v60, 6  ;;  %s3146_s24 = scalar_lea.vmem %s4809_s17, 256  ;;  %p3153_p5 = scmp.lt.s32.totalorder %s4809_s17, %s3151_s15 }
  0xe8   : > { %2661 = vmatpush3.bf16.msra.mxu0 %v2919_v53  ;;  %vm902_vm15 = vcmp.lt.s32.totalorder %v3627_v60, 8  ;;  %v4996_v15 = vmov 0  ;;  %v3680_v16 = vsel %vm3667_vm13, %v838_v4, 0.0  ;;  %v4998_v17 = vmov 0  ;;  %p3147_p13 = scmp.ne.s32.totalorder %s4809_s17, %s3146_s24  ;;  %p3154_p10 = scmp.lt.s32.totalorder %s3152_s30, %s3146_s24 }
  0xe9   : > { %2662 = vmatprep.subr.bf16.mxu0 %v2920_v54  ;;  %v4999_v17 = vsel %vm3686_vm3, 4294967295, %v4998_v17  ;;  %vm3693_vm4 = vcmp.ge.s32.totalorder %v604_v3, 1  ;;  %v5000_v21 = vmov 0  ;;  %vm3697_vm2 = vcmp.lt.s32.totalorder %v602_v0, 7  ;;  %vm3719_vm6 = vmand %vm901_vm14, %vm902_vm15 }
  0xea   : > { %2625 = vmatpush3.bf16.msra.mxu1 %v2909_v41  ;;  %v5001_v21 = vsel %vm3693_vm4, 4294967295, %v5000_v21  ;;  %v5002_v22 = vmov 0  ;;  %vm3701_vm9 = vcmp.lt.s32.totalorder %v603_v1, 7  ;;  %v5004_v23 = vmov 0  ;;  %p3148_p6 = pnand %p3147_p13, %p5236_p1  ;;  %p3155_p0 = por %p3154_p10, %p3153_p5 }
  0xeb   : > { %2626 = vmatprep.subr.bf16.mxu1 %v2910_v42  ;;  %v5003_v22 = vsel %vm3697_vm2, 4294967295, %v5002_v22  ;;  %v5005_v23 = vsel %vm3701_vm9, 4294967295, %v5004_v23  ;;  %v5006_v24 = vmov 0  ;;  %v5008_v28 = vmov 0 }
  0xec   : > { %2663 = vmatpush3.bf16.msra.mxu0 %v2920_v54  ;;  %v5007_v24 = vsel %vm3709_vm5, 4294967295, %v5006_v24  ;;  %v5009_v28 = vsel %vm3719_vm6, 4294967295, %v5008_v28  ;;  %v3725_v29 = vadd.s32 32, %v3623_v57  ;;  %vm5010_vm8 = vcmp.lt.s32.totalorder %v3627_v60, 16  ;;  %p3149_p9 = pneg %p3148_p6 }
  0xed   : > { %2619 = vmatmul.mubr.msk.bf16.gmra.mrb[4].mxu1 %vm4885_vm0, %v680_v38  ;;  %2664 = vmatprep.subr.bf16.mxu0 %v2921_v55  ;;  %vm3674_vm0 = vcmp.ge.s32.totalorder %v603_v1, 1  ;;  %vm5011_vm3 = vcmp.ge.s32.totalorder %v3627_v60, 14  ;;  %v5012_v32 = vmov 0  ;;  %v3739_v33 = vadd.s32 40, %v3623_v57 }
  0xee   : > { %2627 = vmatpush3.bf16.msra.mxu1 %v2910_v42  ;;  %v4997_v15 = vsel %vm3674_vm0, 4294967295, %v4996_v15  ;;  %vm3734_vm13 = vmand %vm5011_vm3, %vm5010_vm8  ;;  %vm5014_vm14 = vcmp.lt.s32.totalorder %v3627_v60, 2  ;;  %v5015_v36 = vmov 0  ;;  %v5018_v40 = vmov 0  ;;  %p3156_p2 = pnand %p3155_p0, %p3149_p9 }
  0xef   : > { %2628 = vmatprep.subr.bf16.mxu1 %v2911_v43  ;;  %v5013_v32 = vsel %vm3734_vm13, 4294967295, %v5012_v32  ;;  %vm3748_vm15 = vmand %vm5014_vm14, %vm3657_vm11  ;;  %v5021_v41 = vmov 0  ;;  %v5029_v48 = vmov 0  ;;  %v606_v49 = vand.u32 7, %v3739_v33 }
  0xf0   : > { %2665 = vmatpush3.bf16.msra.mxu0 %v2921_v55  ;;  %v5016_v36 = vsel %vm3748_vm15, 4294967295, %v5015_v36  ;;  %vm5017_vm3 = vmmov %vm5014_vm14  ;;  %vm5023_vm15 = vcmp.lt.s32.totalorder %v3627_v60, 12  ;;  %v5033_v52 = vmov 0  ;;  %v5035_v55 = vmov 0 }
  0xf1   : > { %vm3774_vm8 = vmand %vm5017_vm3, %vm3674_vm0  ;;  %v5037_v59 = vmov 0  ;;  %vm3921_vm11 = vcmp.lt.s32.totalorder %v606_v49, 7 }
  0xf2   : > { %2629 = vmatpush3.bf16.msra.mxu1 %v2911_v43  ;;  %v5019_v40 = vsel %vm3774_vm8, 4294967295, %v5018_v40  ;;  %vm5020_vm14 = vmmov %vm5017_vm3  ;;  %vm5024_vm3 = vcmp.ge.s32.totalorder %v3627_v60, 10  ;;  %v605_v43 = vand.u32 7, %v3725_v29  ;;  %vm5032_vm8 = vcmp.ge.s32.totalorder %v3627_v60, 16 }
  0xf3   : > { %2630 = vmatprep.subr.bf16.mxu1 %v2912_v44  ;;  %vm3782_vm10 = vmand %vm5020_vm14, %vm3693_vm4  ;;  %vm5027_vm14 = vcmp.lt.s32.totalorder %v3627_v60, 14 }
  0xf4   : > { %v5022_v41 = vsel %vm3782_vm10, 4294967295, %v5021_v41  ;;  %vm3794_vm13 = vmand %vm5024_vm3, %vm5023_vm15  ;;  %vm5028_vm15 = vcmp.ge.s32.totalorder %v3627_v60, 12  ;;  %vm5031_vm10 = vcmp.lt.s32.totalorder %v3627_v60, 18  ;;  %vm3904_vm7 = vcmp.lt.s32.totalorder %v605_v43, 7 }
  0xf5   : > { %vm3812_vm3 = vmand %vm5028_vm15, %vm5027_vm14  ;;  %vm3865_vm14 = vcmp.ge.s32.totalorder %v605_v43, 1  ;;  %vm5044_vm15 = vnez %v5013_v32 }
  0xf6   : > { %2631 = vmatpush3.bf16.msra.mxu1 %v2912_v44  ;;  %v3800_v44 = vadd.s32 48, %v3623_v57  ;;  %v5030_v48 = vsel %vm3812_vm3, 4294967295, %v5029_v48  ;;  %vm3835_vm4 = vmand %vm5032_vm8, %vm5031_vm10  ;;  %vm3851_vm10 = vcmp.lt.s32.totalorder %v604_v3, 7  ;;  %v5038_v59 = vsel %vm3865_vm14, 4294967295, %v5037_v59 }
  0xf7   : > { %2632 = vmatprep.subr.bf16.mxu1 %v2913_v45  ;;  %v5034_v52 = vsel %vm3835_vm4, 4294967295, %v5033_v52  ;;  %v5036_v55 = vsel %vm3851_vm10, 4294967295, %v5035_v55  ;;  %vm5039_vm8 = vnez %v4995_v9  ;;  %vm5041_vm14 = vnez %v4999_v17 }
  0xf8   : > { %v607_v61 = vand.u32 7, %v3800_v44  ;;  %vm3887_vm3 = vcmp.ge.s32.totalorder %v606_v49, 1 }
  0xfa   : > { %2633 = vmatpush3.bf16.msra.mxu1 %v2913_v45  ;;  %v3803_v45 = vadd.s32 56, %v3623_v57 }
  0xfb   : > { %2634 = vmatprep.subr.bf16.mxu1 %v2914_v46 }
  0xfc   : > { %v608_v62 = vand.u32 7, %v3803_v45 }
  0xfe   : > { %2635 = vmatpush3.bf16.msra.mxu1 %v2914_v46 }
  0xff   : > { %2636 = vmatprep.subr.bf16.mxu1 %v2915_v47 }
 0x102   : > { %2637 = vmatpush3.bf16.msra.mxu1 %v2915_v47 }
 0x1b8   : > { %v2616_v6 = vpop.f32.mrb[0].mxu1 }
 0x1b9   : > { %v774_v10 = vmul.f32 %v2616_v6, %v3643_v2  ;;  %v734_v14 = vpop.f32.mrb[1].mxu1 }
 0x1ba   : > { %v772_v19 = vmul.f32 %v3643_v2, %v734_v14  ;;  %v2617_v20 = vpop.f32.mrb[2].mxu1 }
 0x1bb   : > { %v789_v25 = vadd.f32 %v3651_v5, %v774_v10  ;;  %v775_v26 = vmul.f32 %v2617_v20, %v3643_v2  ;;  %v737_v27 = vpop.f32.mrb[3].mxu1  ;;  %v5045_v20 = vmov 0 }
 0x1bc   : > { %v787_v30 = vadd.f32 %v3651_v5, %v772_v19  ;;  %v773_v31 = vmul.f32 %v3643_v2, %v737_v27  ;;  %v5046_v20 = vsel %vm3904_vm7, 4294967295, %v5045_v20  ;;  %vm5059_vm7 = vmand %vm3709_vm5, %vm3701_vm9 }
 0x1bd   : > { %v3741_v34 = vmax.f32 %v789_v25, 0.0  ;;  %v790_v35 = vadd.f32 %v3651_v5, %v775_v26 }
 0x1be   : > { %v3758_v37 = vmax.f32 %v787_v30, 0.0  ;;  %v788_v38 = vadd.f32 %v3651_v5, %v773_v31  ;;  %v5047_v30 = vmov 0 }
 0x1bf   : > { %805 = vst [vmem:[#allocation2 + $0x19] sm:$0xff] %v3741_v34  ;;  %v3768_v39 = vmax.f32 %v790_v35, 0.0  ;;  %v852_v3 = vsel %vm5039_vm8, %v3741_v34, 0.0  ;;  %v934_v4 = vsel %vm5041_vm14, %v3741_v34, 0.0  ;;  %v5048_v30 = vsel %vm3921_vm11, 4294967295, %v5047_v30 }
 0x1c0   : > { %803 = vst [vmem:[#allocation2 + $0x9] sm:$0xff] %v3758_v37  ;;  %v3806_v46 = vmax.f32 %v788_v38, 0.0  ;;  %v2620_v47 = vpop.f32.mrb[4].mxu1  ;;  %v850_v14 = vsel %vm5039_vm8, %v3758_v37, 0.0  ;;  %v932_v27 = vsel %vm5041_vm14, %v3758_v37, 0.0  ;;  %vm5049_vm11 = vnez %v5016_v36 }
 0x1c1   : > { %806 = vst [vmem:[#allocation2 + $0x21] sm:$0xff] %v3768_v39  ;;  %v778_v50 = vmul.f32 %v2620_v47, %v3643_v2  ;;  %v750_v51 = vpop.f32.mrb[5].mxu1 }
 0x1c2   : > { %804 = vst [vmem:[#allocation2 + $0x11] sm:$0xff] %v3806_v46  ;;  %v776_v53 = vmul.f32 %v3643_v2, %v750_v51  ;;  %v2621_v54 = vpop.f32.mrb[6].mxu1  ;;  %v851_v33 = vsel %vm5039_vm8, %v3806_v46, 0.0  ;;  %vm5052_vm8 = vnez %v5019_v40 }
 0x1c3   : > { %v793_v56 = vadd.f32 %v3651_v5, %v778_v50  ;;  %v779_v57 = vmul.f32 %v2621_v54, %v3643_v2  ;;  %v753_v58 = vpop.f32.mrb[7].mxu1  ;;  %v933_v50 = vsel %vm5041_vm14, %v3806_v46, 0.0  ;;  %vm5054_vm14 = vmand %vm3709_vm5, %vm3697_vm2 }
 0x1c4   : > { %v791_v0 = vadd.f32 %v3651_v5, %v776_v53  ;;  %v777_v1 = vmul.f32 %v3643_v2, %v753_v58  ;;  %v5042_v2 = vmov 0 }
 0x1c5   : > { %v5043_v2 = vsel %vm3887_vm3, 4294967295, %v5042_v2  ;;  %v3891_v6 = vmax.f32 %v793_v56, 0.0  ;;  %v794_v10 = vadd.f32 %v3651_v5, %v779_v57  ;;  %vm5050_vm3 = vmand %vm3709_vm5, %vm3661_vm12 }
 0x1c6   : > { %v3908_v25 = vmax.f32 %v791_v0, 0.0  ;;  %v792_v26 = vadd.f32 %v3651_v5, %v777_v1  ;;  %v1008_v1 = vsel %vm5044_vm15, %v3806_v46, 0.0  ;;  %vm5060_vm15 = vnez %v4991_v7 }
 0x1c7   : > { %809 = vst [vmem:[#allocation2 + $0x39] sm:$0xff] %v3891_v6  ;;  %v3926_v5 = vmax.f32 %v794_v10, 0.0  ;;  %v812_v31 = vld [vmem:[#allocation2 + $0x8] sm:$0xff] }
 0x1c8   : > { %v865_v35 = vld [vmem:[#allocation2 + $0x2] sm:$0xff]  ;;  %807 = vst [vmem:[#allocation2 + $0x29] sm:$0xff] %v3908_v25  ;;  %v3942_v43 = vmax.f32 %v792_v26, 0.0  ;;  %v831_v47 = vsel %vm5049_vm11, %v812_v31, 0.0  ;;  %v1025_v51 = vld [vmem:[#allocation2 + $0x1a] sm:$0xff]  ;;  %vm5053_vm11 = vnez %v5022_v41 }
 0x1c9   : > { %v884_v49 = vsel %vm5050_vm3, %v865_v35, 0.0  ;;  %810 = vst [vmem:[#allocation2 + $0x41] sm:$0xff] %v3926_v5  ;;  %v813_v53 = vld [vmem:[#allocation2 + $0x10] sm:$0xff]  ;;  %v814_v54 = vld [vmem:[#allocation2 + $0x18] sm:$0xff]  ;;  %v858_v56 = vadd.f32 %v850_v14, %v831_v47  ;;  %vm5051_vm3 = vmand %vm3719_vm6, %vm3633_vm1 }
 0x1ca   : > { %v866_v57 = vld [vmem:[#allocation2 + $0xa] sm:$0xff]  ;;  %v892_v58 = vadd.f32 %v884_v49, %v3680_v16  ;;  %v912_v0 = vsel %vm5051_vm3, %v812_v31, 0.0  ;;  %808 = vst [vmem:[#allocation2 + $0x31] sm:$0xff] %v3942_v43  ;;  %v832_v10 = vsel %vm5052_vm8, %v813_v53, 0.0  ;;  %v833_v14 = vsel %vm5053_vm11, %v814_v54, 0.0  ;;  %v867_v26 = vld [vmem:[#allocation2 + $0x12] sm:$0xff]  ;;  %vm5055_vm3 = vmand %vm3835_vm4, %vm3697_vm2 }
 0x1cb   : > { %v885_v35 = vsel %vm5054_vm14, %v866_v57, 0.0  ;;  %v3983_v46 = vsel %vm5055_vm3, %v1025_v51, 0.0  ;;  %vm5056_vm8 = vnez %v5030_v48  ;;  %v859_v31 = vadd.f32 %v851_v33, %v832_v10  ;;  %vm5057_vm14 = vmand %vm3709_vm5, %vm3851_vm10  ;;  %v815_v10 = vld [vmem:[#allocation2 + $0x20] sm:$0xff] }
 0x1cc   : > { %v860_v47 = vadd.f32 %v852_v3, %v833_v14  ;;  %v893_v49 = vadd.f32 %v885_v35, %v858_v56  ;;  %v887_v37 = vsel %vm5057_vm14, %v1025_v51, 0.0  ;;  %vm5058_vm11 = vnez %v5001_v21  ;;  %vm5061_vm1 = vmand %vm3719_vm6, %vm5060_vm15 }
 0x1cd   : > { %v886_v19 = vsel %vm5059_vm7, %v867_v26, 0.0  ;;  %v913_v3 = vsel %vm5061_vm1, %v813_v53, 0.0  ;;  %vm5062_vm14 = vmand %vm3719_vm6, %vm3674_vm0  ;;  %v920_v56 = vadd.f32 %v912_v0, %v892_v58  ;;  %vm5065_vm3 = vnez %v4989_v63 }
 0x1ce   : > { %v914_v33 = vsel %vm5062_vm14, %v814_v54, 0.0  ;;  %v894_v14 = vadd.f32 %v886_v19, %v859_v31  ;;  %v921_v35 = vadd.f32 %v913_v3, %v893_v49  ;;  %vm5063_vm1 = vmand %vm3794_vm13, %vm3661_vm12  ;;  %v895_v31 = vadd.f32 %v887_v37, %v860_v47 }
 0x1cf   : > { %v960_v38 = vsel %vm5063_vm1, %v866_v57, 0.0  ;;  %vm5064_vm7 = vmand %vm3794_vm13, %vm3697_vm2  ;;  %v940_v0 = vadd.f32 %v932_v27, %v920_v56  ;;  %vm5069_vm2 = vcmp.lt.s32.totalorder %v3627_v60, 2  ;;  %v5070_v49 = vmov 0  ;;  %v869_v47 = vld [vmem:[#allocation2 + $0x22] sm:$0xff] }
 0x1d0   : > { %v961_v58 = vsel %vm5064_vm7, %v867_v26, 0.0  ;;  %vm5066_vm5 = vmand %vm5056_vm8, %vm5065_vm3  ;;  %vm5068_vm7 = vnez %v5038_v59  ;;  %vm4051_vm14 = vcmp.ge.s32.totalorder %v607_v61, 1  ;;  %v5072_v27 = vmov 0 }
 0x1d1   : > { %v988_v19 = vsel %vm5066_vm5, %v813_v53, 0.0  ;;  %vm5067_vm1 = vmand %vm5056_vm8, %vm5060_vm15  ;;  %v5073_v27 = vsel %vm4051_vm14, 4294967295, %v5072_v27  ;;  %v922_v53 = vadd.f32 %v914_v33, %v894_v14  ;;  %v941_v3 = vadd.f32 %v933_v50, %v921_v35 }
 0x1d2   : > { %v989_v57 = vsel %vm5067_vm1, %v814_v54, 0.0  ;;  %vm4045_vm0 = vmand %vm5069_vm2, %vm5068_vm7  ;;  %v816_v54 = vld [vmem:[#allocation2 + $0x28] sm:$0xff]  ;;  %vm5076_vm1 = vnez %v5043_v2  ;;  %vm5077_vm15 = vcmp.lt.s32.totalorder %v3627_v60, 2  ;;  %v5078_v50 = vmov 0 }
 0x1d3   : > { %v5071_v49 = vsel %vm4045_vm0, 4294967295, %v5070_v49  ;;  %vm5074_vm5 = vmand %vm3835_vm4, %vm3661_vm12  ;;  %vm4075_vm12 = vcmp.ge.s32.totalorder %v608_v62, 1  ;;  %v968_v33 = vadd.f32 %v960_v38, %v940_v0  ;;  %vm5087_vm14 = vnez %v5046_v20 }
 0x1d4   : > { %v1043_v37 = vsel %vm5074_vm5, %v867_v26, 0.0  ;;  %vm5075_vm2 = vmand %vm3719_vm6, %vm5058_vm11  ;;  %v5081_v26 = vmov 0  ;;  %v5089_v38 = vmov 0  ;;  %v969_v0 = vadd.f32 %v961_v58, %v941_v3 }
 0x1d5   : > { %v915_v56 = vsel %vm5075_vm2, %v815_v10, 0.0  ;;  %vm4069_vm3 = vmand %vm5077_vm15, %vm5076_vm1  ;;  %v5082_v26 = vsel %vm4075_vm12, 4294967295, %v5081_v26  ;;  %vm5085_vm15 = vnez %v4997_v15  ;;  %vm5088_vm1 = vnez %v5007_v24 }
 0x1d6   : > { %v5079_v50 = vsel %vm4069_vm3, 4294967295, %v5078_v50  ;;  %5083 = vst [vmem:[#allocation30_spill] sm:$0xff] %v5082_v26  ;;  %v923_v14 = vadd.f32 %v915_v56, %v895_v31  ;;  %vm5084_vm5 = vmand %vm3794_vm13, %vm3701_vm9  ;;  %vm4095_vm12 = vcmp.lt.s32.totalorder %v607_v61, 7  ;;  %vm5091_vm9 = vnez %v4999_v17 }
 0x1d7   : > { %5080 = vst [vmem:[#allocation29_spill] sm:$0xff] %v5079_v50  ;;  %v962_v35 = vsel %vm5084_vm5, %v1025_v51, 0.0  ;;  %vm5086_vm2 = vmand %vm5056_vm8, %vm5085_vm15  ;;  %v5090_v38 = vsel %vm4095_vm12, 4294967295, %v5089_v38  ;;  %v942_v51 = vadd.f32 %v934_v4, %v922_v53  ;;  %vm5094_vm3 = vnez %v5048_v30 }
 0x1d8   : > { %v990_v29 = vsel %vm5086_vm2, %v815_v10, 0.0  ;;  %vm5092_vm5 = vmand %vm3794_vm13, %vm3851_vm10  ;;  %vm4119_vm12 = vcmp.lt.s32.totalorder %v608_v62, 7  ;;  %v5095_v61 = vmov 0  ;;  %v996_v4 = vadd.f32 %v988_v19, %v968_v33  ;;  %v1027_v19 = vld [vmem:[#allocation2 + $0x2a] sm:$0xff] }
 0x1d9   : > { %v963_v31 = vsel %vm5092_vm5, %v869_v47, 0.0  ;;  %vm5093_vm2 = vmand %vm5056_vm8, %vm5058_vm11  ;;  %v5096_v61 = vsel %vm4119_vm12, 4294967295, %v5095_v61  ;;  %v5097_v58 = vsel %vm5091_vm9, %v3768_v39, 0.0  ;;  %vm5098_vm5 = vnez %v5013_v32 }
 0x1da   : > { %v991_v44 = vsel %vm5093_vm2, %v816_v54, 0.0  ;;  %v943_v53 = vadd.f32 %v5097_v58, %v923_v14  ;;  %v1011_v3 = vsel %vm5098_vm5, %v3908_v25, 0.0  ;;  %v834_v56 = vsel %vm4045_vm0, %v815_v10, 0.0  ;;  %vm5106_vm0 = vmand %vm5088_vm1, %vm5087_vm14 }
 0x1db   : > { %v997_v45 = vadd.f32 %v989_v57, %v969_v0  ;;  %v970_v62 = vadd.f32 %v962_v35, %v942_v51  ;;  %vm5099_vm15 = vnez %v5005_v23  ;;  %vm5101_vm12 = vnez %v5079_v50 }
 0x1dc   : > { %vm5100_vm11 = vmand %vm3835_vm4, %vm5099_vm15  ;;  %v835_v14 = vsel %vm5101_vm12, %v816_v54, 0.0  ;;  %vm5102_vm9 = vnez %v5043_v2  ;;  %v1016_v10 = vadd.f32 %v1008_v1, %v996_v4  ;;  %v971_v58 = vadd.f32 %v963_v31, %v943_v53  ;;  %v817_v4 = vld [vmem:[#allocation2 + $0x30] sm:$0xff] }
 0x1dd   : > { %v1045_v33 = vsel %vm5100_vm11, %v869_v47, 0.0  ;;  %vm5103_vm2 = vnez %v4995_v9  ;;  %v5105_v0 = vsel %vm5098_vm5, %v3741_v34, 0.0  ;;  %v998_v31 = vadd.f32 %v990_v29, %v970_v62  ;;  %vm5107_vm11 = vmand %vm5088_vm1, %vm5094_vm3 }
 0x1de   : > { %v854_v57 = vsel %vm5103_vm2, %v3908_v25, 0.0  ;;  %v5104_v35 = vsel %vm5103_vm2, %v3768_v39, 0.0  ;;  %v1017_v1 = vadd.f32 %v5105_v0, %v997_v45  ;;  %v888_v50 = vsel %vm5106_vm0, %v869_v47, 0.0  ;;  %vm5109_vm0 = vmand %vm3719_vm6, %vm5068_vm7 }
 0x1df   : > { %v861_v51 = vadd.f32 %v5104_v35, %v834_v56  ;;  %v862_v53 = vadd.f32 %v854_v57, %v835_v14  ;;  %v1051_v56 = vadd.f32 %v1043_v37, %v1016_v10  ;;  %v999_v35 = vadd.f32 %v991_v44, %v971_v58  ;;  %vm5110_vm15 = vmand %vm3835_vm4, %vm3851_vm10  ;;  %v871_v10 = vld [vmem:[#allocation2 + $0x32] sm:$0xff] }
 0x1e0   : > { %v889_v34 = vsel %vm5107_vm11, %v1027_v19, 0.0  ;;  %v1052_v47 = vadd.f32 %v3983_v46, %v1017_v1  ;;  %v5108_v45 = vsel %vm5098_vm5, %v3768_v39, 0.0  ;;  %v916_v62 = vsel %vm5109_vm0, %v816_v54, 0.0  ;;  %vm5111_vm12 = vmand %vm3719_vm6, %vm5102_vm9  ;;  %v818_v1 = vld [vmem:[#allocation2 + $0x38] sm:$0xff] }
 0x1e1   : > { %v896_v29 = vadd.f32 %v888_v50, %v861_v51  ;;  %v1018_v37 = vadd.f32 %v5108_v45, %v998_v31  ;;  %v897_v44 = vadd.f32 %v889_v34, %v862_v53  ;;  %v1019_v50 = vadd.f32 %v1011_v3, %v999_v35  ;;  %v1029_v45 = vld [vmem:[#allocation2 + $0x3a] sm:$0xff] }
 0x1e2   : > { %v1046_v39 = vsel %vm5110_vm15, %v1027_v19, 0.0  ;;  %v917_v46 = vsel %vm5111_vm12, %v817_v4, 0.0  ;;  %v1059_v54 = vpack.c.bf16 %v1052_v47, %v1051_v56  ;;  %vm5112_vm11 = vnez %v4999_v17 }
 0x1e3   : > { %v924_v14 = vadd.f32 %v916_v62, %v896_v29  ;;  %v1053_v3 = vadd.f32 %v1045_v33, %v1018_v37  ;;  %v925_v58 = vadd.f32 %v917_v46, %v897_v44  ;;  %v936_v57 = vsel %vm5112_vm11, %v3908_v25, 0.0 }
 0x1e4   : > { %vm5113_vm15 = vnez %v5073_v27  ;;  %vm5114_vm10 = vcmp.lt.s32.totalorder %v3627_v60, 2  ;;  %v5115_v51 = vmov 0  ;;  %v1054_v0 = vadd.f32 %v1046_v39, %v1019_v50  ;;  %2638 = vmatprep.mubr.bf16.mxu1 %v1059_v54  ;;  %v900_v54 = vld [vmem:[#allocation2 + $0x40] sm:$0xff] }
 0x1e5   : > { %vm4215_vm5 = vmand %vm5114_vm10, %vm5113_vm15  ;;  %v937_v33 = vsel %vm5112_vm11, %v3942_v43, 0.0  ;;  %v944_v31 = vadd.f32 %v936_v57, %v924_v14  ;;  %vm5117_vm12 = vnez %v5082_v26  ;;  %v5119_v25 = vmov 0 }
 0x1e6   : > { %v5116_v51 = vsel %vm4215_vm5, 4294967295, %v5115_v51  ;;  %vm5118_vm0 = vmmov %vm5114_vm10  ;;  %v856_v53 = vsel %vm5103_vm2, %v3891_v6, 0.0  ;;  %v945_v56 = vadd.f32 %v937_v33, %v925_v58  ;;  %vm5122_vm11 = vnez %v5090_v38 }
 0x1e7   : > { %vm4226_vm4 = vmand %vm5118_vm0, %vm5117_vm12  ;;  %v1060_v60 = vpack.c.bf16 %v1054_v0, %v1053_v3  ;;  %v855_v34 = vsel %vm5103_vm2, %v3942_v43, 0.0  ;;  %v836_v44 = vsel %vm4215_vm5, %v817_v4, 0.0  ;;  %vm5134_vm5 = vnez %v5046_v20 }
 0x1e8   : > { %v5120_v25 = vsel %vm4226_vm4, 4294967295, %v5119_v25  ;;  %vm5121_vm10 = vmand %vm3794_vm13, %vm5087_vm14  ;;  %v837_v62 = vsel %vm4226_vm4, %v818_v1, 0.0  ;;  %v863_v46 = vadd.f32 %v855_v34, %v836_v44  ;;  %vm5129_vm4 = vnez %v5034_v52  ;;  %v2524_v52 = vld [vmem:[%s5145_s25 + $0x1] ss:$0 sm:$0xff] }
 0x1e9   : > { %v964_v35 = vsel %vm5121_vm10, %v1027_v19, 0.0  ;;  %vm5123_vm12 = vmand %vm3794_vm13, %vm5094_vm3  ;;  %vm5124_vm10 = vnez %v5096_v61  ;;  %2639 = vmatmul.mubr.bf16.vlgmr.msra.gmra.mrb[8].mxu1 %v1060_v60  ;;  %v864_v14 = vadd.f32 %v856_v53, %v837_v62 }
 0x1ea   : > { %v965_v29 = vsel %vm5123_vm12, %v871_v10, 0.0  ;;  %v972_v47 = vadd.f32 %v964_v35, %v944_v31  ;;  %vm5125_vm0 = vmand %vm5056_vm8, %vm5068_vm7  ;;  %vm5128_vm12 = vnez %v5013_v32 }
 0x1eb   : > { %v973_v19 = vadd.f32 %v965_v29, %v945_v56  ;;  %v992_v37 = vsel %vm5125_vm0, %v817_v4, 0.0  ;;  %vm5126_vm14 = vmand %vm5056_vm8, %vm5102_vm9  ;;  %vm5127_vm0 = vnez %v5082_v26  ;;  %v1012_v3 = vsel %vm5128_vm12, %v3942_v43, 0.0 }
 0x1ec   : > { %v993_v50 = vsel %vm5126_vm14, %v818_v1, 0.0  ;;  %v1000_v39 = vadd.f32 %v992_v37, %v972_v47  ;;  %vm5130_vm14 = vmand %vm5088_vm1, %vm5122_vm11  ;;  %v1013_v43 = vsel %vm5128_vm12, %v3891_v6, 0.0  ;;  %v948_v47 = vld [vmem:[#allocation2 + $0x42] sm:$0xff] }
 0x1ed   : > { %v1001_v4 = vadd.f32 %v993_v50, %v973_v19  ;;  %v890_v58 = vsel %vm5130_vm14, %v871_v10, 0.0  ;;  %vm5131_vm7 = vmand %vm5088_vm1, %vm5124_vm10 }
 0x1ee   : > { %v891_v57 = vsel %vm5131_vm7, %v1029_v45, 0.0  ;;  %v1020_v0 = vadd.f32 %v1012_v3, %v1000_v39  ;;  %v898_v33 = vadd.f32 %v890_v58, %v863_v46  ;;  %vm5132_vm9 = vmand %vm3719_vm6, %vm5113_vm15  ;;  %vm5137_vm7 = vnez %v4999_v17  ;;  %v976_v39 = vld [vmem:[#allocation2 + $0x48] sm:$0xff] }
 0x1ef   : > { %v899_v31 = vadd.f32 %v891_v57, %v864_v14  ;;  %v1021_v53 = vadd.f32 %v1013_v43, %v1001_v4  ;;  %v918_v56 = vsel %vm5132_vm9, %v818_v1, 0.0  ;;  %vm5133_vm14 = vmand %vm3719_vm6, %vm5127_vm0  ;;  %v939_v44 = vsel %vm5137_vm7, %v3926_v5, 0.0  ;;  %v1031_v58 = vld [vmem:[#allocation2 + $0x4a] sm:$0xff] }
 0x1f0   : > { %v919_v35 = vsel %vm5133_vm14, %v900_v54, 0.0  ;;  %vm5135_vm1 = vmand %vm5129_vm4, %vm5134_vm5  ;;  %v926_v34 = vadd.f32 %v918_v56, %v898_v33  ;;  %v1014_v33 = vsel %vm5128_vm12, %v3926_v5, 0.0  ;;  %v1252_v5 = vpack.c.bf16 %v3579_v12, %v3577_v11  ;;  %v2926_v11 = vld [vmem:[%s4861_s7 + $0x8] sm:$0xff]   ;;  %v2927_v12 = vld [vmem:[%s4861_s7 + $0x10] sm:$0xff]  }
 0x1f1   : > { %v1047_v60 = vsel %vm5135_vm1, %v871_v10, 0.0  ;;  %vm5136_vm9 = vmand %vm5129_vm4, %vm5094_vm3  ;;  %v927_v29 = vadd.f32 %v919_v35, %v899_v31  ;;  %v938_v10 = vsel %vm5137_vm7, %v3891_v6, 0.0  ;;  %vm5164_vm3 = vnez %v5022_v41 }
 0x1f2   : > { %v1048_v1 = vsel %vm5136_vm9, %v1029_v45, 0.0  ;;  %v1055_v19 = vadd.f32 %v1047_v60, %v1020_v0  ;;  %v946_v62 = vadd.f32 %v938_v10, %v926_v34  ;;  %vm5138_vm14 = vmand %vm3794_vm13, %vm5122_vm11  ;;  %v1253_v34 = vpack.c.bf16 %v3585_v18, %v3581_v13  ;;  %v2928_v13 = vld [vmem:[%s4861_s7 + $0x18] sm:$0xff]   ;;  %v2929_v18 = vld [vmem:[%s4861_s7 + $0x20] sm:$0xff]  }
 0x1f3   : > { %v1056_v37 = vadd.f32 %v1048_v1, %v1021_v53  ;;  %v947_v50 = vadd.f32 %v939_v44, %v927_v29  ;;  %v966_v6 = vsel %vm5138_vm14, %v1029_v45, 0.0  ;;  %vm5139_vm1 = vmand %vm3794_vm13, %vm5124_vm10  ;;  %v2922_v1 = vld [vmem:[#allocation12 + $0x28] sm:$0xff]   ;;  %v2923_v29 = vld [vmem:[#allocation12 + $0x30] sm:$0xff]  }
 0x1f4   : > { %v967_v14 = vsel %vm5139_vm1, %v948_v47, 0.0  ;;  %v974_v4 = vadd.f32 %v966_v6, %v946_v62  ;;  %vm1042_vm9 = vmand %vm5129_vm4, %vm5124_vm10  ;;  %2666 = vmatprep.subr.bf16.mxu0 %v2922_v1  ;;  %v2471_v44 = vld [vmem:[%s5146_s12] ss:$0 sm:$0xff] }
 0x1f5   : > { %v1061_v46 = vpack.c.bf16 %v1056_v37, %v1055_v19  ;;  %v975_v3 = vadd.f32 %v967_v14, %v947_v50  ;;  %vm5140_vm14 = vmand %vm5056_vm8, %vm5113_vm15  ;;  %v4369_v31 = vsel %vm1042_vm9, %v1031_v58, 0.0  ;;  %2667 = vmatpush3.bf16.msra.mxu0 %v2922_v1  ;;  %vm5143_vm9 = vcmask 130048   ;;  %v2925_v19 = vld [vmem:[%s4861_s7] sm:$0xff]  }
 0x1f6   : > { %v994_v45 = vsel %vm5140_vm14, %v900_v54, 0.0  ;;  %vm5141_vm1 = vmand %vm5056_vm8, %vm5127_vm0  ;;  %5142 = vst [vmem:[#allocation31_spill] sm:$0xff] %v4369_v31  ;;  %2652 = vmatprep.mubr.msk.bf16.mxu0 %vm5143_vm9, %v1252_v5  ;;  %2668 = vmatprep.subr.bf16.mxu0 %v2923_v29  ;;  %v2470_v37 = vld [vmem:[%s5145_s25] ss:$0 sm:$0xff] }
 0x1f7   : > { %2642 = vmatprep.mubr.bf16.mxu1 %v1061_v46  ;;  %v995_v57 = vsel %vm5141_vm1, %v976_v39, 0.0  ;;  %v1002_v43 = vadd.f32 %v994_v45, %v974_v4  ;;  %vm4941_vm10 = vmand %vm5129_vm4, %vm5122_vm11  ;;  %2680 = vmatprep.subr.bf16.mxu1 %v2925_v19  ;;  %vm5155_vm1 = vnez %v5016_v36  ;;  %vm5163_vm11 = vnez %v5019_v40 }
 0x1f8   : > { %v1003_v0 = vadd.f32 %v995_v57, %v975_v3  ;;  %v1049_v53 = vsel %vm4941_vm10, %v948_v47, 0.0  ;;  %vm5144_vm14 = vmmov %vm5143_vm9  ;;  %v2924_v47 = vld [vmem:[#allocation12 + $0x38] sm:$0xff]   ;;  %2681 = vmatpush3.bf16.msra.mxu1 %v2925_v19  ;;  %vm5156_vm9 = vnez %v5007_v24  ;;  %v5211_v24 = vld [vmem:[#allocation30_spill] sm:$0xff] }
 0x1f9   : > { %v1022_v54 = vadd.f32 %v1014_v33, %v1002_v43  ;;  %2653 = vmatmul.mubr.msk.bf16.gmra.mrb[4].mxu0 %vm5144_vm14, %v1253_v34  ;;  %2682 = vmatprep.subr.bf16.mxu1 %v2926_v11  ;;  %vm5157_vm14 = vnez %v4993_v8 }
 0x1fa   : > { %v1058_v35 = vadd.f32 %v4369_v31, %v1003_v0  ;;  %2669 = vmatpush3.bf16.msra.mxu0 %v2923_v29  ;;  %vm5158_vm10 = vmand %vm5156_vm9, %vm5157_vm14 }
 0x1fb   : > { %v1057_v56 = vadd.f32 %v1049_v53, %v1022_v54  ;;  %2670 = vmatprep.subr.bf16.mxu0 %v2924_v47 }
 0x1fc   : > { %2683 = vmatpush3.bf16.msra.mxu1 %v2926_v11 }
 0x1fd   : > { %v1062_v60 = vpack.c.bf16 %v1058_v35, %v1057_v56  ;;  %2684 = vmatprep.subr.bf16.mxu1 %v2927_v12  ;;  %v5224_v48 = vld [vmem:[#allocation31_spill] sm:$0xff] }
 0x1fe   : > { %2671 = vmatpush3.bf16.msra.mxu0 %v2924_v47 }
 0x1ff   : > { %2643 = vmatmul.mubr.bf16.gmra.mrb[12].mxu1 %v1062_v60 }
 0x200   : > { %2685 = vmatpush3.bf16.msra.mxu1 %v2927_v12 }
 0x201   : > { %2686 = vmatprep.subr.bf16.mxu1 %v2928_v13 }
 0x204   : > { %2687 = vmatpush3.bf16.msra.mxu1 %v2928_v13 }
 0x205   : > { %2688 = vmatprep.subr.bf16.mxu1 %v2929_v18 }
 0x208   : > { %2689 = vmatpush3.bf16.msra.mxu1 %v2929_v18 }
 0x2bc   : > { %v2640_v10 = vpop.f32.mrb[8].mxu1 }
 0x2bd   : > { %v1201_v62 = vmul.f32 %v2640_v10, %v2470_v37  ;;  %v1161_v50 = vpop.f32.mrb[9].mxu1 }
 0x2be   : > { %v1199_v39 = vmul.f32 %v2470_v37, %v1161_v50  ;;  %v2641_v46 = vpop.f32.mrb[10].mxu1 }
 0x2bf   : > { %v1216_v6 = vadd.f32 %v2471_v44, %v1201_v62  ;;  %v1202_v14 = vmul.f32 %v2641_v46, %v2470_v37  ;;  %v1164_v4 = vpop.f32.mrb[11].mxu1 }
 0x2c0   : > { %v1214_v3 = vadd.f32 %v2471_v44, %v1199_v39  ;;  %v1200_v58 = vmul.f32 %v2470_v37, %v1164_v4  ;;  %v2485_v4 = vld [vmem:[#allocation9] ss:$0 sm:$0xff] }
 0x2c1   : > { %v1217_v45 = vadd.f32 %v2471_v44, %v1202_v14  ;;  %v1224_v43 = vmax.f32 %v1216_v6, 0.0  ;;  %v2930_v14 = vld [vmem:[%s4861_s7 + $0x28] sm:$0xff]  }
 0x2c2   : > { %v1215_v57 = vadd.f32 %v2471_v44, %v1200_v58  ;;  %v1222_v33 = vmax.f32 %v1214_v3, 0.0  ;;  %2690 = vmatprep.subr.bf16.mxu1 %v2930_v14  ;;  %v2486_v58 = vld [vmem:[#allocation11] ss:$0 sm:$0xff] }
 0x2c3   : > { %v1225_v0 = vmax.f32 %v1217_v45, 0.0  ;;  %2691 = vmatpush3.bf16.msra.mxu1 %v2930_v14 }
 0x2c4   : > { %v1223_v54 = vmax.f32 %v1215_v57, 0.0 }
 0x2c5   : > { %v1231_v53 = vpack.c.bf16 %v1225_v0, %v1224_v43 }
 0x2c6   : > { %v1230_v56 = vpack.c.bf16 %v1223_v54, %v1222_v33 }
 0x2c8   : > { %2672 = vmatprep.mubr.bf16.mxu0 %v1230_v56 }
 0x2c9   : > { %2673 = vmatmul.mubr.bf16.vlgmr.msra.gmra.mrb[0].mxu0 %v1231_v53 }
 0x2d2   : > { %v2644_v35 = vpop.f32.mrb[12].mxu1 }
 0x2d3   : > { %v1205_v60 = vmul.f32 %v2644_v35, %v2470_v37  ;;  %v1177_v1 = vpop.f32.mrb[13].mxu1 }
 0x2d4   : > { %v1203_v5 = vmul.f32 %v2470_v37, %v1177_v1  ;;  %v2645_v34 = vpop.f32.mrb[14].mxu1 }
 0x2d5   : > { %v1220_v29 = vadd.f32 %v2471_v44, %v1205_v60  ;;  %v1206_v47 = vmul.f32 %v2645_v34, %v2470_v37  ;;  %v1180_v19 = vpop.f32.mrb[15].mxu1 }
 0x2d6   : > { %v1218_v11 = vadd.f32 %v2471_v44, %v1203_v5  ;;  %v1204_v12 = vmul.f32 %v2470_v37, %v1180_v19  ;;  %v2931_v37 = vld [vmem:[%s4861_s7 + $0x30] sm:$0xff]  }
 0x2d7   : > { %v1221_v13 = vadd.f32 %v2471_v44, %v1206_v47  ;;  %v1228_v10 = vmax.f32 %v1220_v29, 0.0  ;;  %2692 = vmatprep.subr.bf16.mxu1 %v2931_v37 }
 0x2d8   : > { %v1219_v18 = vadd.f32 %v2471_v44, %v1204_v12  ;;  %v1226_v50 = vmax.f32 %v1218_v11, 0.0  ;;  %2693 = vmatpush3.bf16.msra.mxu1 %v2931_v37  ;;  %v2932_v44 = vld [vmem:[%s4861_s7 + $0x38] sm:$0xff]  }
 0x2d9   : > { %v1229_v62 = vmax.f32 %v1221_v13, 0.0  ;;  %2694 = vmatprep.subr.bf16.mxu1 %v2932_v44 }
 0x2da   : > { %v1227_v39 = vmax.f32 %v1219_v18, 0.0 }
 0x2db   : > { %v1233_v46 = vpack.c.bf16 %v1229_v62, %v1228_v10 }
 0x2dc   : > { %v1232_v6 = vpack.c.bf16 %v1227_v39, %v1226_v50  ;;  %2695 = vmatpush3.bf16.msra.mxu1 %v2932_v44 }
 0x2de   : > { %2676 = vmatprep.mubr.bf16.mxu0 %v1232_v6 }
 0x2df   : > { %2677 = vmatmul.mubr.bf16.gmra.mrb[4].mxu0 %v1233_v46 }
 0x39c   : > { %v4413_v3 = vpop.f32.mrb[0].mxu0 }
 0x39d   : > { %5147 = vst [vmem:[#allocation32_spill] sm:$0xff] %v4413_v3  ;;  %v1478_v45 = vmul.f32 %v4413_v3, %v2485_v4  ;;  %v4416_v57 = vpop.f32.mrb[1].mxu0 }
 0x39e   : > { %5148 = vst [vmem:[#allocation33_spill] sm:$0xff] %v4416_v57  ;;  %v1476_v43 = vmul.f32 %v2485_v4, %v4416_v57  ;;  %v4419_v0 = vpop.f32.mrb[2].mxu0 }
 0x39f   : > { %5149 = vst [vmem:[#allocation34_spill] sm:$0xff] %v4419_v0  ;;  %v1492_v33 = vadd.f32 %v2486_v58, %v1478_v45  ;;  %v1479_v54 = vmul.f32 %v4419_v0, %v2485_v4  ;;  %v4422_v53 = vpop.f32.mrb[3].mxu0 }
 0x3a0   : > { %5150 = vst [vmem:[#allocation35_spill] sm:$0xff] %v4422_v53  ;;  %v1490_v56 = vadd.f32 %v2486_v58, %v1476_v43  ;;  %v1477_v35 = vmul.f32 %v2485_v4, %v4422_v53 }
 0x3a1   : > { %v1493_v60 = vadd.f32 %v2486_v58, %v1479_v54  ;;  %v1500_v5 = vmax.f32 %v1492_v33, 0.0 }
 0x3a2   : > { %v1491_v1 = vadd.f32 %v2486_v58, %v1477_v35  ;;  %v1498_v29 = vmax.f32 %v1490_v56, 0.0 }
 0x3a3   : > { %v1501_v34 = vmax.f32 %v1493_v60, 0.0  ;;  %v2933_v60 = vld [vmem:[%s4864_s10 + $0x40] sm:$0xff]  }
 0x3a4   : > { %v1499_v47 = vmax.f32 %v1491_v1, 0.0  ;;  %2704 = vmatprep.subr.bf16.mxu0 %v2933_v60  ;;  %v2936_v1 = vld [vmem:[%s4864_s10 + $0x58] sm:$0xff]  }
 0x3a5   : > { %v1507_v19 = vpack.c.bf16 %v1501_v34, %v1500_v5  ;;  %2705 = vmatpush3.bf16.msra.mxu0 %v2933_v60  ;;  %v2937_v5 = vld [vmem:[%s4864_s10 + $0x60] sm:$0xff]   ;;  %v2938_v34 = vld [vmem:[%s4864_s10 + $0x68] sm:$0xff]  }
 0x3a6   : > { %v1506_v11 = vpack.c.bf16 %v1499_v47, %v1498_v29  ;;  %v2939_v29 = vld [vmem:[%s4864_s10 + $0x70] sm:$0xff]   ;;  %v2940_v47 = vld [vmem:[%s4864_s10 + $0x78] sm:$0xff]  }
 0x3a8   : > { %2696 = vmatprep.mubr.bf16.mxu1 %v1506_v11  ;;  %v2942_v11 = vld [vmem:[#allocation12 + $0x48] sm:$0xff]  }
 0x3a9   : > { %2697 = vmatmul.mubr.bf16.vlgmr.msra.gmra.mrb[16].mxu1 %v1507_v19  ;;  %v2941_v19 = vld [vmem:[#allocation12 + $0x40] sm:$0xff]  }
 0x3aa   : > { %2728 = vmatprep.subr.bf16.mxu1 %v2941_v19 }
 0x3ab   : > { %2729 = vmatpush3.bf16.msra.mxu1 %v2941_v19 }
 0x3ac   : > { %2730 = vmatprep.subr.bf16.mxu1 %v2942_v11 }
 0x3af   : > { %2731 = vmatpush3.bf16.msra.mxu1 %v2942_v11 }
 0x3b2   : > { %v4425_v12 = vpop.f32.mrb[4].mxu0 }
 0x3b3   : > { %5151 = vst [vmem:[#allocation36_spill] sm:$0xff] %v4425_v12  ;;  %v1482_v13 = vmul.f32 %v4425_v12, %v2485_v4  ;;  %v4428_v18 = vpop.f32.mrb[5].mxu0 }
 0x3b4   : > { %5152 = vst [vmem:[#allocation37_spill] sm:$0xff] %v4428_v18  ;;  %v1480_v10 = vmul.f32 %v2485_v4, %v4428_v18  ;;  %v4431_v62 = vpop.f32.mrb[6].mxu0 }
 0x3b5   : > { %5153 = vst [vmem:[#allocation38_spill] sm:$0xff] %v4431_v62  ;;  %v1496_v50 = vadd.f32 %v2486_v58, %v1482_v13  ;;  %v1483_v39 = vmul.f32 %v4431_v62, %v2485_v4  ;;  %v4434_v46 = vpop.f32.mrb[7].mxu0  ;;  %v2943_v13 = vld [vmem:[#allocation12 + $0x50] sm:$0xff]  }
 0x3b6   : > { %5154 = vst [vmem:[#allocation39_spill] sm:$0xff] %v4434_v46  ;;  %v1494_v6 = vadd.f32 %v2486_v58, %v1480_v10  ;;  %v1481_v14 = vmul.f32 %v2485_v4, %v4434_v46  ;;  %v2934_v4 = vld [vmem:[%s4864_s10 + $0x48] sm:$0xff]   ;;  %2732 = vmatprep.subr.bf16.mxu1 %v2943_v13 }
 0x3b7   : > { %v1497_v37 = vadd.f32 %v2486_v58, %v1483_v39  ;;  %v1504_v45 = vmax.f32 %v1496_v50, 0.0  ;;  %2706 = vmatprep.subr.bf16.mxu0 %v2934_v4  ;;  %v2944_v10 = vld [vmem:[#allocation12 + $0x58] sm:$0xff]   ;;  %2733 = vmatpush3.bf16.msra.mxu1 %v2943_v13  ;;  %v2945_v50 = vld [vmem:[#allocation12 + $0x60] sm:$0xff]   ;;  %v4464_v39 = vld [vmem:[%s4862_s8 + $0x1] ss:$0 sm:$0xff] }
 0x3b8   : > { %v1495_v44 = vadd.f32 %v2486_v58, %v1481_v14  ;;  %v1502_v33 = vmax.f32 %v1494_v6, 0.0  ;;  %v2935_v58 = vld [vmem:[%s4864_s10 + $0x50] sm:$0xff]   ;;  %2707 = vmatpush3.bf16.msra.mxu0 %v2934_v4  ;;  %2734 = vmatprep.subr.bf16.mxu1 %v2944_v10  ;;  %v4469_v14 = vld [vmem:[%s4863_s9 + $0x1] ss:$0 sm:$0xff] }
 0x3b9   : > { %v1505_v43 = vmax.f32 %v1497_v37, 0.0  ;;  %2708 = vmatprep.subr.bf16.mxu0 %v2935_v58 }
 0x3ba   : > { %v1503_v54 = vmax.f32 %v1495_v44, 0.0 }
 0x3bb   : > { %v1509_v56 = vpack.c.bf16 %v1505_v43, %v1504_v45  ;;  %2735 = vmatpush3.bf16.msra.mxu1 %v2944_v10 }
 0x3bc   : > { %v1508_v35 = vpack.c.bf16 %v1503_v54, %v1502_v33  ;;  %2709 = vmatpush3.bf16.msra.mxu0 %v2935_v58  ;;  %2736 = vmatprep.subr.bf16.mxu1 %v2945_v50 }
 0x3bd   : > { %2710 = vmatprep.subr.bf16.mxu0 %v2936_v1 }
 0x3be   : > { %2700 = vmatprep.mubr.bf16.mxu1 %v1508_v35 }
 0x3bf   : > { %2701 = vmatmul.mubr.bf16.gmra.mrb[20].mxu1 %v1509_v56 }
 0x3c0   : > { %2711 = vmatpush3.bf16.msra.mxu0 %v2936_v1  ;;  %2737 = vmatpush3.bf16.msra.mxu1 %v2945_v50 }
 0x3c1   : > { %2712 = vmatprep.subr.bf16.mxu0 %v2937_v5 }
 0x3c4   : > { %2713 = vmatpush3.bf16.msra.mxu0 %v2937_v5 }
 0x3c5   : > { %2714 = vmatprep.subr.bf16.mxu0 %v2938_v34 }
 0x3c8   : > { %2715 = vmatpush3.bf16.msra.mxu0 %v2938_v34 }
 0x3c9   : > { %2716 = vmatprep.subr.bf16.mxu0 %v2939_v29 }
 0x3cc   : > { %2717 = vmatpush3.bf16.msra.mxu0 %v2939_v29 }
 0x3cd   : > { %2718 = vmatprep.subr.bf16.mxu0 %v2940_v47 }
 0x3d0   : > { %2719 = vmatpush3.bf16.msra.mxu0 %v2940_v47 }
 0x47c   : > { %v2698_v6 = vpop.f32.mrb[16].mxu1 }
 0x47d   : > { %v1633_v37 = vmul.f32 %v2698_v6, %v4464_v39  ;;  %v1592_v44 = vpop.f32.mrb[17].mxu1 }
 0x47e   : > { %v1631_v45 = vmul.f32 %v4464_v39, %v1592_v44  ;;  %v2699_v43 = vpop.f32.mrb[18].mxu1 }
 0x47f   : > { %v1649_v33 = vadd.f32 %v4469_v14, %v1633_v37  ;;  %v1634_v54 = vmul.f32 %v2699_v43, %v4464_v39  ;;  %v1595_v56 = vpop.f32.mrb[19].mxu1 }
 0x480   : > { %v1647_v35 = vadd.f32 %v4469_v14, %v1631_v45  ;;  %v1632_v60 = vmul.f32 %v4464_v39, %v1595_v56 }
 0x481   : > { %v4477_v4 = vmax.f32 %v1649_v33, 0.0  ;;  %v1650_v58 = vadd.f32 %v4469_v14, %v1634_v54 }
 0x482   : > { %v1655_v1 = vmax.f32 %v1647_v35, 0.0  ;;  %v1648_v5 = vadd.f32 %v4469_v14, %v1632_v60 }
 0x483   : > { %1665 = vst [vmem:[#allocation2 + $0x19] sm:$0xff] %v4477_v4  ;;  %v4482_v34 = vmax.f32 %v1650_v58, 0.0  ;;  %v1698_v11 = vsel %vm5103_vm2, %v4477_v4, 0.0  ;;  %v1755_v50 = vsel %vm5137_vm7, %v4477_v4, 0.0 }
 0x484   : > { %1663 = vst [vmem:[#allocation2 + $0x9] sm:$0xff] %v1655_v1  ;;  %v4484_v29 = vmax.f32 %v1648_v5, 0.0  ;;  %v1696_v19 = vsel %vm5103_vm2, %v1655_v1, 0.0  ;;  %v1753_v10 = vsel %vm5137_vm7, %v1655_v1, 0.0 }
 0x485   : > { %1666 = vst [vmem:[#allocation2 + $0x21] sm:$0xff] %v4482_v34 }
 0x486   : > { %1664 = vst [vmem:[#allocation2 + $0x11] sm:$0xff] %v4484_v29  ;;  %v1697_v37 = vsel %vm5103_vm2, %v4484_v29, 0.0  ;;  %v1754_v43 = vsel %vm5137_vm7, %v4484_v29, 0.0 }
 0x48b   : > { %v1672_v47 = vld [vmem:[#allocation2 + $0x8] sm:$0xff] }
 0x48c   : > { %v1711_v13 = vld [vmem:[#allocation2 + $0x2] sm:$0xff]  ;;  %v1680_v6 = vsel %vm5155_vm1, %v1672_v47, 0.0  ;;  %v4503_v44 = vld [vmem:[#allocation2 + $0x1a] sm:$0xff]  ;;  %vm5159_vm1 = vnez %v5036_v55 }
 0x48d   : > { %v1719_v45 = vsel %vm5158_vm10, %v1711_v13, 0.0  ;;  %v1673_v33 = vld [vmem:[#allocation2 + $0x10] sm:$0xff]  ;;  %v1674_v54 = vld [vmem:[#allocation2 + $0x18] sm:$0xff]  ;;  %v1704_v36 = vadd.f32 %v1696_v19, %v1680_v6  ;;  %vm5160_vm0 = vmand %vm5156_vm9, %vm5159_vm1  ;;  %vm5161_vm10 = vnez %v4989_v63  ;;  %vm5167_vm1 = vnez %v4991_v7 }
 0x48e   : > { %v1712_v56 = vld [vmem:[#allocation2 + $0xa] sm:$0xff]  ;;  %v1722_v35 = vsel %vm5160_vm0, %v4503_v44, 0.0  ;;  %v1727_v60 = vadd.f32 %v1719_v45, %v3680_v16  ;;  %vm5162_vm15 = vmand %vm3719_vm6, %vm5161_vm10  ;;  %v1681_v5 = vsel %vm5163_vm11, %v1673_v33, 0.0  ;;  %v1682_v19 = vsel %vm5164_vm3, %v1674_v54, 0.0  ;;  %v1713_v13 = vld [vmem:[#allocation2 + $0x12] sm:$0xff] }
 0x48f   : > { %v1736_v58 = vsel %vm5162_vm15, %v1672_v47, 0.0  ;;  %vm5165_vm0 = vnez %v5003_v22  ;;  %vm5168_vm2 = vmand %vm3719_vm6, %vm5167_vm1  ;;  %v1705_v45 = vadd.f32 %v1697_v37, %v1681_v5  ;;  %v1706_v46 = vadd.f32 %v1698_v11, %v1682_v19  ;;  %v4546_v12 = vld [vmem:[#allocation2 + $0x20] sm:$0xff] }
 0x490   : > { %vm5166_vm5 = vmand %vm5156_vm9, %vm5165_vm0  ;;  %v1737_v47 = vsel %vm5168_vm2, %v1673_v33, 0.0  ;;  %vm5169_vm3 = vnez %v5005_v23  ;;  %v1744_v37 = vadd.f32 %v1736_v58, %v1727_v60  ;;  %vm5173_vm15 = vnez %v5001_v21 }
 0x491   : > { %v1720_v16 = vsel %vm5166_vm5, %v1712_v56, 0.0  ;;  %vm5170_vm11 = vmand %vm5156_vm9, %vm5169_vm3  ;;  %vm5171_vm5 = vnez %v4997_v15  ;;  %v1730_v57 = vadd.f32 %v1722_v35, %v1706_v46  ;;  %v1804_v7 = vsel %vm5128_vm12, %v4484_v29, 0.0 }
 0x492   : > { %v2702_v1 = vpop.f32.mrb[20].mxu1  ;;  %v1721_v41 = vsel %vm5170_vm11, %v1713_v13, 0.0  ;;  %v1728_v53 = vadd.f32 %v1720_v16, %v1704_v36  ;;  %vm5172_vm2 = vmand %vm3719_vm6, %vm5171_vm5  ;;  %v1761_v36 = vadd.f32 %v1753_v10, %v1744_v37  ;;  %v1806_v37 = vsel %vm5128_vm12, %v4482_v34, 0.0 }
 0x493   : > { %v1637_v6 = vmul.f32 %v2702_v1, %v4464_v39  ;;  %v1608_v40 = vpop.f32.mrb[21].mxu1  ;;  %v1738_v1 = vsel %vm5172_vm2, %v1674_v54, 0.0  ;;  %v1729_v0 = vadd.f32 %v1721_v41, %v1705_v45  ;;  %vm5174_vm11 = vmand %vm3719_vm6, %vm5173_vm15 }
 0x494   : > { %v1635_v62 = vmul.f32 %v4464_v39, %v1608_v40  ;;  %v2703_v18 = vpop.f32.mrb[22].mxu1  ;;  %v1745_v31 = vadd.f32 %v1737_v47, %v1728_v53  ;;  %vm5175_vm2 = vmand %vm3794_vm13, %vm5157_vm14 }
 0x495   : > { %v1653_v11 = vadd.f32 %v4469_v14, %v1637_v6  ;;  %v1638_v5 = vmul.f32 %v2703_v18, %v4464_v39  ;;  %v1611_v19 = vpop.f32.mrb[23].mxu1  ;;  %v1739_v18 = vsel %vm5174_vm11, %v4546_v12, 0.0  ;;  %v1746_v60 = vadd.f32 %v1738_v1, %v1729_v0  ;;  %vm5176_vm11 = vmand %vm3794_vm13, %vm5165_vm0 }
 0x496   : > { %v1651_v40 = vadd.f32 %v4469_v14, %v1635_v62  ;;  %v1636_v3 = vmul.f32 %v4464_v39, %v1611_v19  ;;  %v1747_v46 = vadd.f32 %v1739_v18, %v1730_v57  ;;  %v1762_v39 = vadd.f32 %v1754_v43, %v1745_v31  ;;  %vm5177_vm6 = vmand %vm3794_vm13, %vm5169_vm3 }
 0x497   : > { %v4557_v16 = vmax.f32 %v1653_v11, 0.0  ;;  %v1654_v26 = vadd.f32 %v4469_v14, %v1638_v5  ;;  %v1763_v10 = vadd.f32 %v1755_v50, %v1746_v60  ;;  %v1770_v35 = vsel %vm5175_vm2, %v1712_v56, 0.0  ;;  %vm5178_vm2 = vmand %vm5056_vm8, %vm5161_vm10 }
 0x498   : > { %v4566_v58 = vmax.f32 %v1651_v40, 0.0  ;;  %v1652_v62 = vadd.f32 %v4469_v14, %v1636_v3  ;;  %v1771_v0 = vsel %vm5176_vm11, %v1713_v13, 0.0  ;;  %v1778_v3 = vadd.f32 %v1770_v35, %v1761_v36  ;;  %vm5179_vm11 = vmand %vm5056_vm8, %vm5167_vm1  ;;  %v5188_v35 = vld [vmem:[#allocation29_spill] sm:$0xff] }
 0x499   : > { %1669 = vst [vmem:[#allocation2 + $0x39] sm:$0xff] %v4557_v16  ;;  %v4570_v53 = vmax.f32 %v1654_v26, 0.0  ;;  %v1772_v26 = vsel %vm5177_vm6, %v4503_v44, 0.0  ;;  %v1779_v57 = vadd.f32 %v1771_v0, %v1762_v39  ;;  %v1787_v50 = vsel %vm5178_vm2, %v1673_v33, 0.0  ;;  %vm5180_vm6 = vmand %vm5056_vm8, %vm5171_vm5 }
 0x49a   : > { %1667 = vst [vmem:[#allocation2 + $0x29] sm:$0xff] %v4566_v58  ;;  %v4583_v31 = vmax.f32 %v1652_v62, 0.0  ;;  %v1780_v14 = vadd.f32 %v1772_v26, %v1763_v10  ;;  %v1788_v43 = vsel %vm5179_vm11, %v1674_v54, 0.0  ;;  %v1756_v56 = vsel %vm5137_vm7, %v4482_v34, 0.0  ;;  %vm5181_vm1 = vmand %vm5129_vm4, %vm5157_vm14 }
 0x49b   : > { %1670 = vst [vmem:[#allocation2 + $0x41] sm:$0xff] %v4570_v53  ;;  %v1795_v47 = vadd.f32 %v1787_v50, %v1778_v3  ;;  %v1796_v6 = vadd.f32 %v1788_v43, %v1779_v57  ;;  %v1764_v45 = vadd.f32 %v1756_v56, %v1747_v46  ;;  %v1789_v63 = vsel %vm5180_vm6, %v4546_v12, 0.0  ;;  %vm5182_vm10 = vmand %vm5129_vm4, %vm5165_vm0 }
 0x49c   : > { %1668 = vst [vmem:[#allocation2 + $0x31] sm:$0xff] %v4583_v31  ;;  %v1805_v33 = vsel %vm5128_vm12, %v4477_v4, 0.0  ;;  %v1797_v54 = vadd.f32 %v1789_v63, %v1780_v14  ;;  %v1828_v15 = vsel %vm5181_vm1, %v1713_v13, 0.0  ;;  %v1829_v4 = vsel %vm5182_vm10, %v4503_v44, 0.0  ;;  %vm5187_vm11 = vmand %vm5056_vm8, %vm5173_vm15 }
 0x49d   : > { %v1812_v41 = vadd.f32 %v1804_v7, %v1795_v47  ;;  %v1813_v1 = vadd.f32 %v1805_v33, %v1796_v6  ;;  %vm5183_vm5 = vnez %v5071_v49  ;;  %v1807_v8 = vsel %vm5128_vm12, %v4566_v58, 0.0 }
 0x49e   : > { %v1814_v29 = vadd.f32 %v1806_v37, %v1797_v54  ;;  %v1683_v11 = vsel %vm5183_vm5, %v4546_v12, 0.0  ;;  %vm5184_vm14 = vnez %v4995_v9  ;;  %vm5185_vm0 = vnez %v5036_v55  ;;  %vm5192_vm5 = vmand %vm5129_vm4, %vm5169_vm3 }
 0x49f   : > { %v1836_v5 = vadd.f32 %v1828_v15, %v1812_v41  ;;  %v1837_v19 = vadd.f32 %v1829_v4, %v1813_v1  ;;  %v1699_v13 = vsel %vm5184_vm14, %v4482_v34, 0.0  ;;  %v1700_v22 = vsel %vm5184_vm14, %v4566_v58, 0.0  ;;  %vm5186_vm2 = vmand %vm3794_vm13, %vm5185_vm0 }
 0x4a0   : > { %v1701_v49 = vsel %vm5184_vm14, %v4583_v31, 0.0  ;;  %v1702_v18 = vsel %vm5184_vm14, %v4557_v16, 0.0  ;;  %v1707_v34 = vadd.f32 %v1699_v13, %v1683_v11  ;;  %vm5189_vm6 = vnez %v5188_v35 }
 0x4a1   : > { %v1676_v40 = vld [vmem:[#allocation2 + $0x28] sm:$0xff]  ;;  %v1844_v12 = vpack.c.bf16 %v1837_v19, %v1836_v5  ;;  %vm5190_vm1 = vnez %v5046_v20  ;;  %vm5193_vm15 = vnez %v5116_v51  ;;  %vm5194_vm14 = vnez %v5120_v25 }
 0x4a2   : > { %v1715_v36 = vld [vmem:[#allocation2 + $0x22] sm:$0xff]  ;;  %v1790_v62 = vsel %vm5187_vm11, %v1676_v40, 0.0  ;;  %v1684_v0 = vsel %vm5189_vm6, %v1676_v40, 0.0  ;;  %vm5191_vm10 = vmand %vm5156_vm9, %vm5190_vm1  ;;  %vm5197_vm3 = vnez %v5090_v38  ;;  %v1825_v54 = vld [vmem:[#allocation2 + $0x3a] sm:$0xff]  ;;  %v1758_v11 = vsel %vm5137_vm7, %v4583_v31, 0.0 }
 0x4a3   : > { %v1773_v44 = vsel %vm5186_vm2, %v1715_v36, 0.0  ;;  %v1823_v46 = vld [vmem:[#allocation2 + $0x2a] sm:$0xff]  ;;  %v1678_v10 = vld [vmem:[#allocation2 + $0x38] sm:$0xff]  ;;  %v1723_v9 = vsel %vm5191_vm10, %v1715_v36, 0.0  ;;  %2720 = vmatprep.mubr.bf16.mxu0 %v1844_v12  ;;  %v1830_v21 = vsel %vm5192_vm5, %v1715_v36, 0.0  ;;  %v1708_v57 = vadd.f32 %v1700_v22, %v1684_v0  ;;  %vm5198_vm6 = vmand %vm5156_vm9, %vm5197_vm3 }
 0x4a4   : > { %v1781_v60 = vadd.f32 %v1773_v44, %v1764_v45  ;;  %v1677_v39 = vld [vmem:[#allocation2 + $0x30] sm:$0xff]  ;;  %v1686_v3 = vsel %vm5194_vm14, %v1678_v10, 0.0  ;;  %v1838_v43 = vadd.f32 %v1830_v21, %v1814_v29  ;;  %vm5195_vm2 = vnez %v5048_v30  ;;  %v1735_v55 = vld [vmem:[#allocation2 + $0x40] sm:$0xff] }
 0x4a5   : > { %v1685_v26 = vsel %vm5193_vm15, %v1677_v39, 0.0  ;;  %v1717_v14 = vld [vmem:[#allocation2 + $0x32] sm:$0xff]  ;;  %vm5196_vm11 = vmand %vm5156_vm9, %vm5195_vm2  ;;  %v1710_v23 = vadd.f32 %v1702_v18, %v1686_v3  ;;  %v1731_v25 = vadd.f32 %v1723_v9, %v1707_v34  ;;  %vm5199_vm10 = vnez %v5009_v28  ;;  %v1769_v28 = vld [vmem:[#allocation2 + $0x42] sm:$0xff] }
 0x4a6   : > { %v1798_v50 = vadd.f32 %v1790_v62, %v1781_v60  ;;  %v1709_v56 = vadd.f32 %v1701_v49, %v1685_v26  ;;  %v1724_v47 = vsel %vm5196_vm11, %v1823_v46, 0.0  ;;  %v1725_v51 = vsel %vm5198_vm6, %v1717_v14, 0.0  ;;  %vm5204_vm6 = vmand %vm5129_vm4, %vm5185_vm0  ;;  %v1786_v26 = vld [vmem:[#allocation2 + $0x48] sm:$0xff] }
 0x4a7   : > { %v1732_v6 = vadd.f32 %v1724_v47, %v1708_v57  ;;  %vm5200_vm5 = vnez %v5038_v59  ;;  %vm5202_vm14 = vnez %v5043_v2  ;;  %v1831_v41 = vsel %vm5204_vm6, %v1823_v46, 0.0  ;;  %vm5207_vm0 = vmand %vm3794_vm13, %vm5190_vm1 }
 0x4a8   : > { %v1815_v45 = vadd.f32 %v1807_v8, %v1798_v50  ;;  %v1733_v63 = vadd.f32 %v1725_v51, %v1709_v56  ;;  %vm5201_vm15 = vmand %vm5199_vm10, %vm5200_vm5  ;;  %v1757_v29 = vsel %vm5137_vm7, %v4566_v58, 0.0  ;;  %v1759_v49 = vsel %vm5137_vm7, %v4557_v16, 0.0 }
 0x4a9   : > { %v1740_v7 = vsel %vm5201_vm15, %v1676_v40, 0.0  ;;  %vm5203_vm11 = vmand %vm5199_vm10, %vm5202_vm14  ;;  %vm5205_vm15 = vnez %v5073_v27  ;;  %v1774_v40 = vsel %vm5207_vm0, %v1823_v46, 0.0  ;;  %v1760_v9 = vsel %vm5137_vm7, %v4570_v53, 0.0 }
 0x4aa   : > { %v1741_v33 = vsel %vm5203_vm11, %v1677_v39, 0.0  ;;  %v1748_v1 = vadd.f32 %v1740_v7, %v1731_v25  ;;  %v1839_v15 = vadd.f32 %v1831_v41, %v1815_v45  ;;  %vm5206_vm12 = vmand %vm5199_vm10, %vm5205_vm15  ;;  %v2949_v45 = vld [vmem:[#allocation2] sm:$0xff] }
 0x4ab   : > { %v1749_v37 = vadd.f32 %v1741_v33, %v1732_v6  ;;  %v1742_v4 = vsel %vm5206_vm12, %v1678_v10, 0.0  ;;  %vm5208_vm12 = vnez %v5096_v61  ;;  %vm5210_vm6 = vmand %vm3794_vm13, %vm5195_vm2  ;;  %v2526_v7 = vld [vmem:[%s5146_s12 + $0x1] ss:$0 sm:$0xff] }
 0x4ac   : > { %v1765_v5 = vadd.f32 %v1757_v29, %v1748_v1  ;;  %vm5209_vm11 = vmand %vm5156_vm9, %vm5208_vm12  ;;  %v1845_v58 = vpack.c.bf16 %v1839_v15, %v1838_v43  ;;  %v1775_v8 = vsel %vm5210_vm6, %v1717_v14, 0.0  ;;  %v1750_v22 = vadd.f32 %v1742_v4, %v1733_v63  ;;  %v2946_v63 = vld [vmem:[#allocation12 + $0x68] sm:$0xff]  }
 0x4ad   : > { %v1766_v19 = vadd.f32 %v1758_v11, %v1749_v37  ;;  %v1726_v36 = vsel %vm5209_vm11, %v1825_v54, 0.0  ;;  %vm5212_vm9 = vnez %v5211_v24  ;;  %vm5214_vm11 = vmand %vm5056_vm8, %vm5200_vm5  ;;  %vm5217_vm5 = vnez %v5013_v32  ;;  %2738 = vmatprep.subr.bf16.mxu1 %v2946_v63  ;;  %v2947_v32 = vld [vmem:[#allocation12 + $0x70] sm:$0xff]  }
 0x4ae   : > { %v1734_v13 = vadd.f32 %v1726_v36, %v1710_v23  ;;  %v1782_v12 = vadd.f32 %v1774_v40, %v1765_v5  ;;  %vm5213_vm0 = vmand %vm5199_vm10, %vm5212_vm9  ;;  %2721 = vmatmul.mubr.bf16.vlgmr.msra.gmra.mrb[8].mxu0 %v1845_v58  ;;  %v1791_v34 = vsel %vm5214_vm11, %v1677_v39, 0.0  ;;  %v1767_v46 = vadd.f32 %v1759_v49, %v1750_v22  ;;  %2739 = vmatpush3.bf16.msra.mxu1 %v2946_v63  ;;  %v2201_v63 = vld [vmem:[#allocation14 + $0x88] sm:$0xff] }
 0x4af   : > { %v1783_v44 = vadd.f32 %v1775_v8, %v1766_v19  ;;  %v1743_v18 = vsel %vm5213_vm0, %v1735_v55, 0.0  ;;  %vm5215_vm6 = vmand %vm5056_vm8, %vm5202_vm14  ;;  %v1808_v2 = vsel %vm5217_vm5, %v4583_v31, 0.0  ;;  %v1809_v39 = vsel %vm5217_vm5, %v4557_v16, 0.0  ;;  %2740 = vmatprep.subr.bf16.mxu1 %v2947_v32 }
 0x4b0   : > { %v1792_v60 = vsel %vm5215_vm6, %v1678_v10, 0.0  ;;  %v1751_v62 = vadd.f32 %v1743_v18, %v1734_v13  ;;  %v1799_v35 = vadd.f32 %v1791_v34, %v1782_v12  ;;  %vm5216_vm10 = vmand %vm3794_vm13, %vm5197_vm3  ;;  %v1810_v20 = vsel %vm5217_vm5, %v4570_v53, 0.0  ;;  %v2948_v53 = vld [vmem:[#allocation12 + $0x78] sm:$0xff]  }
 0x4b1   : > { %v1800_v0 = vadd.f32 %v1792_v60, %v1783_v44  ;;  %v1776_v59 = vsel %vm5216_vm10, %v1825_v54, 0.0  ;;  %vm5218_vm7 = vmand %vm3794_vm13, %vm5208_vm12 }
 0x4b2   : > { %v1768_v10 = vadd.f32 %v1760_v9, %v1751_v62  ;;  %v1784_v21 = vadd.f32 %v1776_v59, %v1767_v46  ;;  %v1816_v3 = vadd.f32 %v1808_v2, %v1799_v35  ;;  %v1777_v57 = vsel %vm5218_vm7, %v1769_v28, 0.0  ;;  %vm5219_vm14 = vmand %vm5056_vm8, %vm5205_vm15  ;;  %2741 = vmatpush3.bf16.msra.mxu1 %v2947_v32  ;;  %v2203_v32 = vld [vmem:[#allocation14 + $0x98] sm:$0xff] }
 0x4b3   : > { %v1817_v17 = vadd.f32 %v1809_v39, %v1800_v0  ;;  %v1793_v31 = vsel %vm5219_vm14, %v1735_v55, 0.0  ;;  %vm5220_vm0 = vmand %vm5129_vm4, %vm5190_vm1  ;;  %2742 = vmatprep.subr.bf16.mxu1 %v2948_v53 }
 0x4b4   : > { %v1832_v16 = vsel %vm5220_vm0, %v1717_v14, 0.0  ;;  %vm5221_vm11 = vmand %vm5129_vm4, %vm5195_vm2  ;;  %v1785_v61 = vadd.f32 %v1777_v57, %v1768_v10  ;;  %v1801_v50 = vadd.f32 %v1793_v31, %v1784_v21  ;;  %v2185_v21 = vld [vmem:[#allocation14 + $0x8] sm:$0xff]  ;;  %v2186_v57 = vld [vmem:[#allocation14 + $0x10] sm:$0xff] }
 0x4b5   : > { %v1833_v42 = vsel %vm5221_vm11, %v1825_v54, 0.0  ;;  %v1840_v43 = vadd.f32 %v1832_v16, %v1816_v3  ;;  %vm5222_vm13 = vmand %vm5056_vm8, %vm5212_vm9  ;;  %v2184_v3 = vld [vmem:[#allocation14] sm:$0xff]  ;;  %v2189_v31 = vld [vmem:[#allocation14 + $0x28] sm:$0xff] }
 0x4b6   : > { %v1841_v56 = vadd.f32 %v1833_v42, %v1817_v17  ;;  %v1794_v27 = vsel %vm5222_vm13, %v1786_v26, 0.0  ;;  %v1818_v47 = vadd.f32 %v1810_v20, %v1801_v50  ;;  %vm5223_vm1 = vmand %vm5129_vm4, %vm5197_vm3  ;;  %2743 = vmatpush3.bf16.msra.mxu1 %v2948_v53  ;;  %v2187_v26 = vld [vmem:[#allocation14 + $0x18] sm:$0xff]  ;;  %v2754_v42 = vpack.c.bf16 %v2186_v57, %v2184_v3  ;;  %v2188_v50 = vld [vmem:[#allocation14 + $0x20] sm:$0xff] }
 0x4b7   : > { %v1802_v14 = vadd.f32 %v1794_v27, %v1785_v61  ;;  %v1834_v30 = vsel %vm5223_vm1, %v1769_v28, 0.0  ;;  %v2752_v17 = vpack.c.bf16 %v2187_v26, %v2185_v21  ;;  %v2191_v16 = vld [vmem:[#allocation14 + $0x38] sm:$0xff]  ;;  %v5231_v21 = vld [vmem:[#allocation37_spill] sm:$0xff] }
 0x4b8   : > { %v1846_v23 = vpack.c.bf16 %v1841_v56, %v1840_v43  ;;  %v1842_v51 = vadd.f32 %v1834_v30, %v1818_v47  ;;  %v2756_v61 = vpack.c.bf16 %v2191_v16, %v2189_v31  ;;  %v2190_v43 = vld [vmem:[#allocation14 + $0x30] sm:$0xff]  ;;  %v2193_v56 = vld [vmem:[#allocation14 + $0x48] sm:$0xff]  ;;  %v2195_v27 = vld [vmem:[#allocation14 + $0x58] sm:$0xff] }
 0x4b9   : > { %v1843_v25 = vadd.f32 %v1802_v14, %v5224_v48  ;;  %2753 = vmatprep.subr.bf16.mxu0 %v2752_v17  ;;  %v2758_v20 = vpack.c.bf16 %v2190_v43, %v2188_v50  ;;  %v2760_v14 = vpack.c.bf16 %v2195_v27, %v2193_v56  ;;  %v2192_v47 = vld [vmem:[#allocation14 + $0x40] sm:$0xff]  ;;  %v2197_v30 = vld [vmem:[#allocation14 + $0x68] sm:$0xff]  ;;  %v5233_v16 = vld [vmem:[#allocation39_spill] sm:$0xff] }
 0x4ba   : > { %2724 = vmatprep.mubr.bf16.mxu0 %v1846_v23  ;;  %2755 = vmatpush1.bf16.msra.mxu0 %v2754_v42  ;;  %v2194_v23 = vld [vmem:[#allocation14 + $0x50] sm:$0xff]  ;;  %v5232_v17 = vld [vmem:[#allocation38_spill] sm:$0xff] }
 0x4bb   : > { %v1847_v6 = vpack.c.bf16 %v1843_v25, %v1842_v51  ;;  %2757 = vmatprep.subr.bf16.mxu0 %v2756_v61  ;;  %v2199_v51 = vld [vmem:[#allocation14 + $0x78] sm:$0xff]  ;;  %v2762_v48 = vpack.c.bf16 %v2194_v23, %v2192_v47 }
 0x4bc   : > { %v2764_v25 = vpack.c.bf16 %v2199_v51, %v2197_v30 }
 0x4bd   : > { %2725 = vmatmul.mubr.bf16.gmra.mrb[12].mxu0 %v1847_v6  ;;  %v2196_v6 = vld [vmem:[#allocation14 + $0x60] sm:$0xff] }
 0x4be   : > { %2280 = vmatprep.mubr.f32.mxu0 %v2949_v45  ;;  %2759 = vmatpush1.bf16.msra.mxu0 %v2758_v20  ;;  %v2198_v45 = vld [vmem:[#allocation14 + $0x70] sm:$0xff] }
 0x4bf   : > { %2761 = vmatprep.subr.bf16.mxu0 %v2760_v14  ;;  %v2766_v53 = vpack.c.bf16 %v2198_v45, %v2196_v6 }
 0x4c2   : > { %2763 = vmatpush1.bf16.msra.mxu0 %v2762_v48 }
 0x4c3   : > { %2765 = vmatprep.subr.bf16.mxu0 %v2764_v25 }
 0x4c6   : > { %2767 = vmatpush1.bf16.msra.mxu0 %v2766_v53 }
 0x581   : > { %v2722_v38 = vpop.f32.mrb[8].mxu0 }
 0x582   : > { %v1988_v33 = vmul.f32 %v2722_v38, %v2524_v52  ;;  %v1947_v54 = vpop.f32.mrb[9].mxu0  ;;  %v2200_v38 = vld [vmem:[#allocation14 + $0x80] sm:$0xff] }
 0x583   : > { %v1986_v41 = vmul.f32 %v2524_v52, %v1947_v54  ;;  %v2723_v1 = vpop.f32.mrb[10].mxu0  ;;  %v2207_v54 = vld [vmem:[#allocation14 + $0xb8] sm:$0xff] }
 0x584   : > { %v2004_v37 = vadd.f32 %v2526_v7, %v1988_v33  ;;  %v1989_v15 = vmul.f32 %v2723_v1, %v2524_v52  ;;  %v1950_v4 = vpop.f32.mrb[11].mxu0  ;;  %v2205_v33 = vld [vmem:[#allocation14 + $0xa8] sm:$0xff] }
 0x585   : > { %v2002_v29 = vadd.f32 %v2526_v7, %v1986_v41  ;;  %v1987_v11 = vmul.f32 %v2524_v52, %v1950_v4  ;;  %v2772_v1 = vpack.c.bf16 %v2207_v54, %v2205_v33  ;;  %v2209_v4 = vld [vmem:[#allocation14 + $0xc8] sm:$0xff] }
 0x586   : > { %v2005_v55 = vadd.f32 %v2526_v7, %v1989_v15  ;;  %v2012_v19 = vmax.f32 %v2004_v37, 0.0  ;;  %v2204_v37 = vld [vmem:[#allocation14 + $0xa0] sm:$0xff]  ;;  %v2206_v15 = vld [vmem:[#allocation14 + $0xb0] sm:$0xff] }
 0x587   : > { %v2003_v5 = vadd.f32 %v2526_v7, %v1987_v11  ;;  %v2010_v36 = vmax.f32 %v2002_v29, 0.0  ;;  %v2211_v29 = vld [vmem:[#allocation14 + $0xd8] sm:$0xff]  ;;  %v2774_v11 = vpack.c.bf16 %v2206_v15, %v2204_v37 }
 0x588   : > { %v2013_v40 = vmax.f32 %v2005_v55, 0.0  ;;  %v2776_v55 = vpack.c.bf16 %v2211_v29, %v2209_v4 }
 0x589   : > { %v2011_v58 = vmax.f32 %v2003_v5, 0.0  ;;  %v2208_v5 = vld [vmem:[#allocation14 + $0xc0] sm:$0xff] }
 0x58a   : > { %v2019_v8 = vpack.c.bf16 %v2013_v40, %v2012_v19  ;;  %v2210_v19 = vld [vmem:[#allocation14 + $0xd0] sm:$0xff]  ;;  %v2213_v40 = vld [vmem:[#allocation14 + $0xe8] sm:$0xff] }
 0x58b   : > { %v2018_v13 = vpack.c.bf16 %v2011_v58, %v2010_v36  ;;  %v2215_v36 = vld [vmem:[#allocation14 + $0xf8] sm:$0xff]  ;;  %v2778_v58 = vpack.c.bf16 %v2210_v19, %v2208_v5 }
 0x58d   : > { %2744 = vmatprep.mubr.bf16.mxu1 %v2018_v13  ;;  %v2212_v13 = vld [vmem:[#allocation14 + $0xe0] sm:$0xff] }
 0x58e   : > { %2745 = vmatmul.mubr.bf16.vlgmr.msra.gmra.mrb[24].mxu1 %v2019_v8  ;;  %v2780_v8 = vpack.c.bf16 %v2215_v36, %v2213_v40 }
 0x590   : > { %v2726_v22 = vpop.f32.mrb[12].mxu0 }
 0x591   : > { %v1992_v49 = vmul.f32 %v2726_v22, %v2524_v52  ;;  %v1963_v12 = vpop.f32.mrb[13].mxu0  ;;  %v2214_v22 = vld [vmem:[#allocation14 + $0xf0] sm:$0xff] }
 0x592   : > { %v1990_v44 = vmul.f32 %v2524_v52, %v1963_v12  ;;  %v2727_v24 = vpop.f32.mrb[14].mxu0 }
 0x593   : > { %v2008_v18 = vadd.f32 %v2526_v7, %v1992_v49  ;;  %v1993_v34 = vmul.f32 %v2727_v24, %v2524_v52  ;;  %v1966_v60 = vpop.f32.mrb[15].mxu0  ;;  %v2782_v49 = vpack.c.bf16 %v2214_v22, %v2212_v13 }
 0x594   : > { %v2006_v62 = vadd.f32 %v2526_v7, %v1990_v44  ;;  %v1991_v46 = vmul.f32 %v2524_v52, %v1966_v60  ;;  %v2768_v52 = vpack.c.bf16 %v2203_v32, %v2201_v63  ;;  %v5225_v44 = vld [vmem:[#allocation32_spill] sm:$0xff]  ;;  %v5226_v60 = vld [vmem:[#allocation33_spill] sm:$0xff] }
 0x595   : > { %v2009_v28 = vadd.f32 %v2526_v7, %v1993_v34  ;;  %v2016_v0 = vmax.f32 %v2008_v18, 0.0 }
 0x596   : > { %v2007_v35 = vadd.f32 %v2526_v7, %v1991_v46  ;;  %v2014_v59 = vmax.f32 %v2006_v62, 0.0  ;;  %v2202_v7 = vld [vmem:[#allocation14 + $0x90] sm:$0xff]  ;;  %2769 = vmatprep.subr.bf16.mxu0 %v2768_v52  ;;  %v5227_v46 = vld [vmem:[#allocation34_spill] sm:$0xff] }
 0x597   : > { %v2017_v9 = vmax.f32 %v2009_v28, 0.0  ;;  %v2770_v41 = vpack.c.bf16 %v2202_v7, %v2200_v38 }
 0x598   : > { %v2015_v2 = vmax.f32 %v2007_v35, 0.0 }
 0x599   : > { %v2021_v39 = vpack.c.bf16 %v2017_v9, %v2016_v0  ;;  %2771 = vmatpush1.bf16.msra.mxu0 %v2770_v41  ;;  %v5228_v0 = vld [vmem:[#allocation35_spill] sm:$0xff] }
 0x59a   : > { %v2020_v10 = vpack.c.bf16 %v2015_v2, %v2014_v59  ;;  %2773 = vmatprep.subr.bf16.mxu0 %v2772_v1  ;;  %v5230_v2 = vld [vmem:[#allocation36_spill] sm:$0xff] }
 0x59c   : > { %2748 = vmatprep.mubr.bf16.mxu1 %v2020_v10 }
 0x59d   : > { %2749 = vmatmul.mubr.bf16.gmra.mrb[28].mxu1 %v2021_v39  ;;  %2775 = vmatpush1.bf16.msra.mxu0 %v2774_v11 }
 0x59e   : > { %2777 = vmatprep.subr.bf16.mxu0 %v2776_v55 }
 0x5a1   : > { %2779 = vmatpush1.bf16.msra.mxu0 %v2778_v58 }
 0x5a2   : > { %2781 = vmatprep.subr.bf16.mxu0 %v2780_v8 }
 0x5a5   : > { %2783 = vmatpush1.bf16.msra.mxu0 %v2782_v49 }
 0x661   : > { %v2746_v12 = vpop.f32.mrb[24].mxu1 }
 0x662   : > { %v2130_v24 = vadd.f32 %v2746_v12, %v5225_v44  ;;  %v2121_v18 = vpop.f32.mrb[25].mxu1 }
 0x663   : > { %v2747_v34 = vpop.f32.mrb[26].mxu1  ;;  %v2122_v62 = vadd.f32 %v2121_v18, %v5226_v60 }
 0x664   : > { %v2133_v28 = vadd.f32 %v2747_v34, %v5227_v46  ;;  %v2124_v35 = vpop.f32.mrb[27].mxu1 }
 0x665   : > { %v2125_v9 = vadd.f32 %v2124_v35, %v5228_v0  ;;  %2152 = vxpose.xlu0.b32.start [1/8] (short) (narrow) %v2122_v62, 8 }
 0x669   : > { %2153 = vxpose.xlu0.b32.cont [2/8] (short) (narrow) %v2125_v9, 8 }
 0x66d   : > { %2154 = vxpose.xlu0.b32.cont [3/8] (short) (narrow) %v2130_v24, 8 }
 0x670   : > { %v2750_v59 = vpop.f32.mrb[28].mxu1 }
 0x671   : > { %v2146_v39 = vadd.f32 %v2750_v59, %v5230_v2  ;;  %v2137_v10 = vpop.f32.mrb[29].mxu1  ;;  %2155 = vxpose.xlu0.b32.cont [4/8] (short) (narrow) %v2133_v28, 8 }
 0x672   : > { %v2138_v26 = vadd.f32 %v2137_v10, %v5231_v21  ;;  %v2751_v3 = vpop.f32.mrb[30].mxu1 }
 0x673   : > { %v2149_v57 = vadd.f32 %v2751_v3, %v5232_v17  ;;  %v2140_v31 = vpop.f32.mrb[31].mxu1 }
 0x674   : > { %v2141_v42 = vadd.f32 %v2140_v31, %v5233_v16 }
 0x675   : > { %2156 = vxpose.xlu0.b32.cont [5/8] (short) (narrow) %v2138_v26, 8 }
 0x679   : > { %2157 = vxpose.xlu0.b32.cont [6/8] (short) (narrow) %v2141_v42, 8 }
 0x67d   : > { %2158 = vxpose.xlu0.b32.cont [7/8] (short) (narrow) %v2146_v39, 8 }
 0x681   : > { %2159 = vxpose.xlu0.b32.end [8/8] (short) (narrow) %v2149_v57, 8 }
 0x6e5   : > { %v2168_v61 = vpop.trf.xlu0 }
 0x6e6   : > { %2281 = vmatmul.mubr.f32.vlgmr.msra.gmra.mrb[16].mxu0 %v2168_v61 }
 0x7b9   : > { %v2282_v50 = vpop.f32.mrb[16].mxu0 }
 0x7ba   : > { %2287 = vst [vmem:[%s583_s18] sm:$0xff] %v2282_v50  ;;  %v2284_v43 = vpop.f32.mrb[17].mxu0 }
 0x7bb   : > { %2288 = vst [vmem:[%s583_s18 + $0x8] sm:$0xff] %v2284_v43 }
 0x7bc   : > { %3159 = shalt.err (!%p3156_p2)
}
 0x7bd   : > { %s3160_s23 = scalar_lea.hbm %s4814_s28, 256  ;;  %s3164_s27 = scalar_lea.hbm %s5235_s29, 512 }
 0x7be   : > { %p3161_p3 = scmp.ne.s32.totalorder %s4814_s28, %s3160_s23  ;;  %p3165_p7 = scmp.lt.u32.totalorder %s4814_s28, %s5235_s29 }
 0x7bf   : > { %p3166_p8 = scmp.lt.u32.totalorder %s3164_s27, %s3160_s23  ;;  %p3168_p13 = scmp.lt.u32.totalorder %s3160_s23, %s4814_s28 }
 0x7c0   : > { %p3162_p4 = pnand %p3161_p3, %p5236_p1 }
 0x7c1   : > { %p3167_p11 = por %p3166_p8, %p3165_p7 }
 0x7c2   : > { %p3163_p12 = pneg %p3162_p4 }
 0x7c3   : > { %p3169_p6 = por %p3168_p13, %p3167_p11 }
 0x7c5   : > { %p3170_p9 = pnand %p3169_p6, %p3163_p12 }
 0x7c7   : > { %3173 = shalt.err (!%p3170_p9)
}
 0x7c8   : > { %2820 = dma.vmem_to_hbm [thread:$0]  (%p5236_p1), %s4809_s17, 256, %s4814_s28, %s2290_s21  }
 0x7c9 PF: > { %s5237_s26 = sld [smem:[#allocation24_spill]]  ;;  %s5238_s20 = sld [smem:[#allocation21_spill]] }
 0x7ca   : > { %s5239_s24 = sld [smem:[#allocation28_spill]] }
 0x7cf   : > { %p2862_p5 = scmp.ge.s32.totalorder %s5237_s26, 2  ;;  %s2316_s22 = sand.u32 1, %s5238_s20  }
 0x7d0   : > { %p5240_p10 = scmp.ne.s32.totalorder %s5239_s24, 0  ;;  %s2317_s15 = scalar_lea.sflag [#allocation5], %s2316_s22 }
 0x7d2   : > { %p2845_p0 = pnand %p2862_p5, %p5240_p10 }
 0x7d4   : > { %3207 = dma.done.wait (!%p2845_p0), %s2317_s15, 256  }
 0x7d5   : > { %3209 = vsyncadd (!%p2845_p0), %s2317_s15, 4294967040  ;;  %s5241_s21 = sld [smem:[#allocation25_spill]]  ;;  %s5242_s18 = sld [smem:[#allocation22_spill]] }
 0x7d6   : > { %s5243_s19 = sld [smem:[#allocation23_spill]]  ;;  %s5244_s20 = sld [smem:[#allocation26_spill]] }
 0x7db   : > { %p29_p2 = scmp.ge.s32.totalorder %s5241_s21, 4  }
 0x7dd   :  { %31 = sbr.rel (!%p29_p2) target bundleno = 12 (0xc), region = 150 }
 0x7e4   :  { %2322 = vsyncpa [#allocation4], 1 }
 0x7e5   :  { %2324 = vsyncpa [#allocation4 + $0x1], 1 }
 0x7e6   :  { %2325 = vsyncpa [#allocation7], 1 }
 0x7e7   :  { %2326 = vsyncpa [#allocation10], 1 }
 0x7e8   :  { %2327 = vsyncpa [#allocation13], 1 }
 0x7e9   :  { %2328 = vsyncpa [#allocation5], 1 }
 0x7ea   :  { %2330 = vsyncpa [#allocation5 + $0x1], 1 }

</bundles_post_ra>
